<compile_context>
chip_gen: v5e
topology: v5e:2x2
jax: 0.10.0
libtpu: 0.0.40
codegen_flags: <defaults>
</compile_context>

<pallas_src>
import functools

import jax
import jax.numpy as jnp
from jax.experimental import pallas as pl
from jax.experimental.pallas import tpu as pltpu


def _round_up(x, m):
    return ((x + m - 1) // m) * m


def _cdiv(a, b):
    return -(-a // b)


def _choose_row_tiling(n, tile_max=2048, min_split=512):
    """Pick (tile_n, num_tiles).

    - padding waste bounded to <8 rows per tile (vs up to tile_n-1 before),
    - >=2 grid steps when the bag is large enough to benefit both v7x cores,
    - tile_n <= 2048 (f32 h tile = 8 MiB, double-buffered 16 MiB; fits all gens).
    """
    num_tiles = max(1, _cdiv(n, tile_max))
    if num_tiles == 1 and n >= min_split:
        num_tiles = 2          # let the "parallel" grid axis use both TensorCores
    tile_n = _round_up(_cdiv(n, num_tiles), 8)   # sublane alignment
    num_tiles = _cdiv(n, tile_n)
    return tile_n, num_tiles


def _mil_fc_mc_kernel(h_ref, w1_ref, b1_ref, wc_ref, bc_ref, probs_ref):
    # h arrives as f32 straight from HBM; cast to bf16 on the VPU (hidden under
    # the MXU work) instead of a separate wrapper-side convert+pad pass.
    h = h_ref[...].astype(jnp.bfloat16)

    # FC: Linear(1024 -> 512) + ReLU.  bf16 x bf16 -> f32 accumulation on MXU.
    z = jnp.dot(h, w1_ref[...], preferred_element_type=jnp.float32)
    z = jnp.maximum(z + b1_ref[...], 0.0)                      # (T, H) f32

    # Per-class classifiers Linear(512 -> 1), concatenated column-wise as (H, C).
    # bf16 operands guarantee a single MXU pass despite the C=3 -> lane padding.
    logits = jnp.dot(z.astype(jnp.bfloat16), wc_ref[...],
                     preferred_element_type=jnp.float32)
    logits = logits + bc_ref[...]                              # (T, C) f32

    # Row-wise softmax; exact reciprocal on the EUP (approx=False) for parity
    # with torch F.softmax.
    m = jnp.max(logits, axis=-1, keepdims=True)
    e = jnp.exp(logits - m)
    s = jnp.sum(e, axis=-1, keepdims=True)
    probs_ref[...] = e * pl.reciprocal(s, approx=False)


@functools.partial(jax.jit, static_argnames=("n_classes",))
def mil_fc_mc_forward(h, w1, b1, wc, bc, *, n_classes):
    """Returns (top_instance, Y_prob, Y_hat, y_probs) matching the PyTorch module."""
    N, D_in = h.shape
    H = w1.shape[1]

    tile_n, num_tiles = _choose_row_tiling(N)

    h_f32 = h.astype(jnp.float32)            # no-op if already f32; no pad pass
    w1_bf = w1.astype(jnp.bfloat16)
    wc_bf = wc.astype(jnp.bfloat16)
    b1_2d = b1.reshape(1, H).astype(jnp.float32)
    bc_2d = bc.reshape(1, n_classes).astype(jnp.float32)

    y_probs = pl.pallas_call(
        _mil_fc_mc_kernel,
        out_shape=jax.ShapeDtypeStruct((N, n_classes), jnp.float32),
        grid=(num_tiles,),
        in_specs=[
            pl.BlockSpec((tile_n, D_in), lambda i: (i, 0)),      # h: streamed tiles
            pl.BlockSpec((D_in, H), lambda i: (0, 0)),           # W1: resident
            pl.BlockSpec((1, H), lambda i: (0, 0)),              # b1: resident
            pl.BlockSpec((H, n_classes), lambda i: (0, 0)),      # Wc: resident
            pl.BlockSpec((1, n_classes), lambda i: (0, 0)),      # bc: resident
        ],
        out_specs=pl.BlockSpec((tile_n, n_classes), lambda i: (i, 0)),
        compiler_params=pltpu.CompilerParams(
            dimension_semantics=("parallel",),
            vmem_limit_bytes=48 * 1024 * 1024,
        ),
    )(h_f32, w1_bf, b1_2d, wc_bf, bc_2d)

    # Glue: argmax over the flattened probability matrix (row-major, same as
    # torch .view(1, -1).argmax(1)); top_k == 1.
    flat = jnp.argmax(y_probs.reshape(-1))
    row = flat // n_classes
    col = flat % n_classes

    # Recompute the selected instance's logits in f32 (a single row — trivial);
    # this keeps the kernel to one lane-padded (N, C) output stream.
    h_row = h_f32[row]                                           # (D_in,)
    z_row = jnp.maximum(
        jnp.dot(h_row, w1, precision=jax.lax.Precision.HIGHEST) + b1, 0.0)
    top_instance = (jnp.dot(z_row, wc, precision=jax.lax.Precision.HIGHEST)
                    + bc)[None, :]                               # (1, C)

    Y_prob = y_probs[row][None, :]                               # (1, C)
    Y_hat = col[None]                                            # (1,)
    # TODO(synk): return_features path (gather of fc features z for the top
    # instance) and the dropout=True variant are not implemented.
    return top_instance, Y_prob, Y_hat, y_probs


def init_params(key, d_in=1024, hidden=512, n_classes=3):
    """Deterministic synthetic weights (xavier-ish scaling)."""
    k1, _, k3, _ = jax.random.split(key, 4)
    w1 = jax.random.normal(k1, (d_in, hidden), jnp.float32) * (2.0 / (d_in + hidden)) ** 0.5
    b1 = jnp.zeros((hidden,), jnp.float32)
    # n_classes independent Linear(hidden, 1) layers, stacked column-wise.
    wc = jax.random.normal(k3, (hidden, n_classes), jnp.float32) * (2.0 / (hidden + 1)) ** 0.5
    bc = jnp.zeros((n_classes,), jnp.float32)
    return w1, b1, wc, bc


if __name__ == "__main__":
    key = jax.random.PRNGKey(0)
    k_param, k_in1, k_in2 = jax.random.split(key, 3)

    D_IN = 1024      # size_dict['small'][0]
    HIDDEN = 512     # size_dict['small'][1]
    N_CLASSES = 3    # must be > 2 for MIL_fc_mc

    w1, b1, wc, bc = init_params(k_param, D_IN, HIDDEN, N_CLASSES)

    def reference_probs(h):
        z = jnp.maximum(h @ w1 + b1, 0.0)
        logits = z @ wc + bc
        return jax.nn.softmax(logits, axis=-1)

    # N=8: small demo bag; N=133: exercises the ragged (masked) last block.
    for n, k_in in ((8, k_in1), (133, k_in2)):
        h = jax.random.normal(k_in, (n, D_IN), jnp.float32)

        top_instance, Y_prob, Y_hat, y_probs = mil_fc_mc_forward(
            h, w1, b1, wc, bc, n_classes=N_CLASSES)
        jax.block_until_ready((top_instance, Y_prob, Y_hat, y_probs))

        assert top_instance.shape == (1, N_CLASSES)
        assert Y_prob.shape == (1, N_CLASSES)
        assert Y_hat.shape == (1,)
        assert y_probs.shape == (n, N_CLASSES)
        assert bool(jnp.all(jnp.isfinite(y_probs)))
        # Softmax rows sum to ~1 (exact reciprocal -> tight).
        assert bool(jnp.allclose(jnp.sum(y_probs, axis=-1), 1.0, atol=1e-3))
        # Match the f32 reference within bf16 matmul tolerance.
        ref = reference_probs(h)
        assert bool(jnp.allclose(y_probs, ref, atol=2e-2)), \
            float(jnp.max(jnp.abs(y_probs - ref)))
        assert 0 <= int(Y_hat[0]) < N_CLASSES

    print("KERNEL_OK")
</pallas_src>

<mosaic_0001>
module attributes {stable_mosaic.version = 11 : i64} {
  func.func @_mil_fc_mc_kernel(%arg0: i32, %arg1: memref<8x1024xf32, #tpu.memory_space<vmem>>, %arg2: memref<1024x512xbf16, #tpu.memory_space<vmem>>, %arg3: memref<1x512xf32, #tpu.memory_space<vmem>>, %arg4: memref<512x3xbf16, #tpu.memory_space<vmem>>, %arg5: memref<1x3xf32, #tpu.memory_space<vmem>>, %arg6: memref<8x3xf32, #tpu.memory_space<vmem>>) attributes {dimension_semantics = [#tpu.dimension_semantics<parallel>], iteration_bounds = array<i64: 1>, scalar_prefetch = 0 : i64, scratch_operands = 0 : i64, tpu.core_type = #tpu.core_type<tc>, window_params = [{transform_indices = @transform_0, window_bounds = array<i64: 8, 1024>}, {pipeline_mode = #tpu.pipeline_mode<synchronous>, transform_indices = @transform_1, window_bounds = array<i64: 1024, 512>}, {pipeline_mode = #tpu.pipeline_mode<synchronous>, transform_indices = @transform_2, window_bounds = array<i64: 1, 512>}, {pipeline_mode = #tpu.pipeline_mode<synchronous>, transform_indices = @transform_3, window_bounds = array<i64: 512, 3>}, {pipeline_mode = #tpu.pipeline_mode<synchronous>, transform_indices = @transform_4, window_bounds = array<i64: 1, 3>}, {transform_indices = @transform_5, window_bounds = array<i64: 8, 3>}]} {
    %c0 = arith.constant 0 : index
    %c0_0 = arith.constant 0 : index
    %0 = vector.load %arg1[%c0, %c0_0] : memref<8x1024xf32, #tpu.memory_space<vmem>>, vector<8x1024xf32>
    %1 = arith.truncf %0 : vector<8x1024xf32> to vector<8x1024xbf16>
    %c0_1 = arith.constant 0 : index
    %c0_2 = arith.constant 0 : index
    %2 = vector.load %arg2[%c0_1, %c0_2] : memref<1024x512xbf16, #tpu.memory_space<vmem>>, vector<1024x512xbf16>
    %cst = arith.constant dense<0.000000e+00> : vector<8x512xf32>
    %3 = tpu.matmul %1, %2, %cst {dimension_numbers = #tpu.dot_dimension_numbers<[1], [0], [0], [1], [0, 0, 1, 1], [], []>} : vector<8x1024xbf16>, vector<1024x512xbf16>, vector<8x512xf32> -> vector<8x512xf32>
    %c0_3 = arith.constant 0 : index
    %c0_4 = arith.constant 0 : index
    %4 = vector.load %arg3[%c0_3, %c0_4] : memref<1x512xf32, #tpu.memory_space<vmem>>, vector<1x512xf32>
    %5 = vector.broadcast %4 : vector<1x512xf32> to vector<8x512xf32>
    %6 = arith.addf %3, %5 : vector<8x512xf32>
    %cst_5 = arith.constant 0.000000e+00 : f32
    %7 = vector.broadcast %cst_5 : f32 to vector<8x512xf32>
    %8 = arith.maximumf %6, %7 : vector<8x512xf32>
    %9 = arith.truncf %8 : vector<8x512xf32> to vector<8x512xbf16>
    %c0_6 = arith.constant 0 : index
    %c0_7 = arith.constant 0 : index
    %10 = vector.load %arg4[%c0_6, %c0_7] : memref<512x3xbf16, #tpu.memory_space<vmem>>, vector<512x3xbf16>
    %cst_8 = arith.constant dense<0.000000e+00> : vector<8x3xf32>
    %11 = tpu.matmul %9, %10, %cst_8 {dimension_numbers = #tpu.dot_dimension_numbers<[1], [0], [0], [1], [0, 0, 1, 1], [], []>} : vector<8x512xbf16>, vector<512x3xbf16>, vector<8x3xf32> -> vector<8x3xf32>
    %c0_9 = arith.constant 0 : index
    %c0_10 = arith.constant 0 : index
    %12 = vector.load %arg5[%c0_9, %c0_10] : memref<1x3xf32, #tpu.memory_space<vmem>>, vector<1x3xf32>
    %13 = vector.broadcast %12 : vector<1x3xf32> to vector<8x3xf32>
    %14 = arith.addf %11, %13 : vector<8x3xf32>
    %cst_11 = arith.constant dense<0xFF800000> : vector<8xf32>
    %15 = vector.multi_reduction <maximumf>, %14, %cst_11 [1] : vector<8x3xf32> to vector<8xf32>
    %16 = vector.shape_cast %15 : vector<8xf32> to vector<8x1xf32>
    %17 = vector.broadcast %16 : vector<8x1xf32> to vector<8x3xf32>
    %18 = arith.subf %14, %17 : vector<8x3xf32>
    %19 = math.exp %18 : vector<8x3xf32>
    %cst_12 = arith.constant dense<0.000000e+00> : vector<8xf32>
    %20 = vector.multi_reduction <add>, %19, %cst_12 [1] : vector<8x3xf32> to vector<8xf32>
    %21 = vector.shape_cast %20 : vector<8xf32> to vector<8x1xf32>
    %22 = tpu.reciprocal %21 : vector<8x1xf32> -> vector<8x1xf32>
    %23 = vector.broadcast %22 : vector<8x1xf32> to vector<8x3xf32>
    %24 = arith.mulf %19, %23 : vector<8x3xf32>
    %c0_13 = arith.constant 0 : index
    %c0_14 = arith.constant 0 : index
    %25 = vector.load %arg6[%c0_13, %c0_14] : memref<8x3xf32, #tpu.memory_space<vmem>>, vector<8x3xf32>
    tpu.vector_store %arg6[%c0_13, %c0_14], %24 {strides = array<i32>} : memref<8x3xf32, #tpu.memory_space<vmem>>, vector<8x3xf32>,
    return
  }
  func.func @transform_0(%arg0: i32) -> (i32, i32) {
    %c0_i32 = arith.constant 0 : i32
    %c0_i32_0 = arith.constant 0 : i32
    return %arg0, %c0_i32 : i32, i32
  }
  func.func @transform_1(%arg0: i32) -> (i32, i32) {
    %c0_i32 = arith.constant 0 : i32
    %c0_i32_0 = arith.constant 0 : i32
    %c0_i32_1 = arith.constant 0 : i32
    return %c0_i32, %c0_i32_0 : i32, i32
  }
  func.func @transform_2(%arg0: i32) -> (i32, i32) {
    %c0_i32 = arith.constant 0 : i32
    %c0_i32_0 = arith.constant 0 : i32
    %c0_i32_1 = arith.constant 0 : i32
    return %c0_i32, %c0_i32_0 : i32, i32
  }
  func.func @transform_3(%arg0: i32) -> (i32, i32) {
    %c0_i32 = arith.constant 0 : i32
    %c0_i32_0 = arith.constant 0 : i32
    %c0_i32_1 = arith.constant 0 : i32
    return %c0_i32, %c0_i32_0 : i32, i32
  }
  func.func @transform_4(%arg0: i32) -> (i32, i32) {
    %c0_i32 = arith.constant 0 : i32
    %c0_i32_0 = arith.constant 0 : i32
    %c0_i32_1 = arith.constant 0 : i32
    return %c0_i32, %c0_i32_0 : i32, i32
  }
  func.func @transform_5(%arg0: i32) -> (i32, i32) {
    %c0_i32 = arith.constant 0 : i32
    %c0_i32_0 = arith.constant 0 : i32
    return %arg0, %c0_i32 : i32, i32
  }
}

</mosaic_0001>

<bundles_post_ra>
// kernel: mil_fc_mc_forward.1
= control target key start
LH: loop header
LB: loop body
LE: loop exit
PB: predicated region body
PF: predicated region fallthrough
CT: control target
= control target key end

     0   :  { %vm2318_vm0 = vcmask 23552   ;;  %s5563_s1 = inlined_call_operand.vmem [shape: bf16[1024,512], index: 1, kind: input, shape index: {}]   ;;  %s5564_s0 = inlined_call_operand.vmem [shape: f32[8,1024], index: 0, kind: input, shape index: {}]   ;;  %s5565_s2 = inlined_call_operand.vmem [shape: f32[1,512], index: 2, kind: input, shape index: {}]   ;;  %s5566_s3 = inlined_call_operand.vmem [shape: bf16[512,3], index: 3, kind: input, shape index: {}]   ;;  %s5567_s4 = inlined_call_operand.vmem [shape: f32[1,3], index: 4, kind: input, shape index: {}]   ;;  %s5568_s5 = inlined_call_operand.vmem [shape: f32[8,3], index: 5, kind: output, shape index: {}]  }
   0x1   :  { %v2462_v0 = vld [vmem:[%s5563_s1 + $0xe0] sm:$0xf]  ;;  %v3530_v1 = vld [vmem:[%s5563_s1 + $0xec] sm:$0xf0] }
   0x2   :  { %v2590_v2 = vld [vmem:[%s5563_s1 + $0x1e0] sm:$0xf]  ;;  %v2463_v3 = vor.u32 %v3530_v1, %v2462_v0  ;;  %v3562_v4 = vld [vmem:[%s5563_s1 + $0x1ec] sm:$0xf0] }
   0x3   :  { %v2718_v5 = vld [vmem:[%s5563_s1 + $0x2e0] sm:$0xf]  ;;  %v3594_v6 = vld [vmem:[%s5563_s1 + $0x2ec] sm:$0xf0]  ;;  %v2591_v7 = vor.u32 %v3562_v4, %v2590_v2 }
   0x4   :  { %v2719_v8 = vor.u32 %v3594_v6, %v2718_v5  ;;  %v2846_v9 = vld [vmem:[%s5563_s1 + $0x3e0] sm:$0xf]  ;;  %v3626_v10 = vld [vmem:[%s5563_s1 + $0x3ec] sm:$0xf0]  ;;  %1582 = vmatpush.bf16.msra.mxu0 %v2463_v3 }
   0x5   :  { %v2446_v11 = vld [vmem:[%s5563_s1 + $0xc0] sm:$0xf]  ;;  %v2847_v12 = vor.u32 %v3626_v10, %v2846_v9  ;;  %v3526_v13 = vld [vmem:[%s5563_s1 + $0xcc] sm:$0xf0]  ;;  %1595 = vmatpush.bf16.msra.mxu1 %v2591_v7 }
   0x6   :  { %v2574_v14 = vld [vmem:[%s5563_s1 + $0x1c0] sm:$0xf]  ;;  %v3558_v15 = vld [vmem:[%s5563_s1 + $0x1cc] sm:$0xf0]  ;;  %1608 = vmatpush.bf16.msra.mxu2 %v2719_v8  ;;  %v2447_v16 = vor.u32 %v3526_v13, %v2446_v11 }
   0x7   :  { %v2575_v17 = vor.u32 %v3558_v15, %v2574_v14  ;;  %v2702_v18 = vld [vmem:[%s5563_s1 + $0x2c0] sm:$0xf]  ;;  %v3590_v19 = vld [vmem:[%s5563_s1 + $0x2cc] sm:$0xf0]  ;;  %1621 = vmatpush.bf16.msra.mxu3 %v2847_v12 }
   0x8   :  { %v2830_v20 = vld [vmem:[%s5563_s1 + $0x3c0] sm:$0xf]  ;;  %v2703_v21 = vor.u32 %v3590_v19, %v2702_v18  ;;  %v3622_v22 = vld [vmem:[%s5563_s1 + $0x3cc] sm:$0xf0]  ;;  %1583 = vmatpush.bf16.msra.mxu0 %v2447_v16 }
   0x9   :  { %v2430_v23 = vld [vmem:[%s5563_s1 + $0xa0] sm:$0xf]  ;;  %v3522_v24 = vld [vmem:[%s5563_s1 + $0xac] sm:$0xf0]  ;;  %v2831_v25 = vor.u32 %v3622_v22, %v2830_v20  ;;  %1596 = vmatpush.bf16.msra.mxu1 %v2575_v17 }
   0xa   :  { %v2558_v26 = vld [vmem:[%s5563_s1 + $0x1a0] sm:$0xf]  ;;  %v3554_v27 = vld [vmem:[%s5563_s1 + $0x1ac] sm:$0xf0]  ;;  %v2431_v29 = vor.u32 %v3522_v24, %v2430_v23  ;;  %1609 = vmatpush.bf16.msra.mxu2 %v2703_v21 }
   0xb   :  { %v2686_v28 = vld [vmem:[%s5563_s1 + $0x2a0] sm:$0xf]  ;;  %v3586_v30 = vld [vmem:[%s5563_s1 + $0x2ac] sm:$0xf0]  ;;  %v2559_v33 = vor.u32 %v3554_v27, %v2558_v26  ;;  %1622 = vmatpush.bf16.msra.mxu3 %v2831_v25 }
   0xc   :  { %v2814_v31 = vld [vmem:[%s5563_s1 + $0x3a0] sm:$0xf]  ;;  %v3618_v32 = vld [vmem:[%s5563_s1 + $0x3ac] sm:$0xf0]  ;;  %v2687_v34 = vor.u32 %v3586_v30, %v2686_v28  ;;  %1584 = vmatpush.bf16.msra.mxu0 %v2431_v29 }
   0xd   :  { %v2414_v35 = vld [vmem:[%s5563_s1 + $0x80] sm:$0xf]  ;;  %v3518_v36 = vld [vmem:[%s5563_s1 + $0x8c] sm:$0xf0]  ;;  %v2815_v38 = vor.u32 %v3618_v32, %v2814_v31  ;;  %1597 = vmatpush.bf16.msra.mxu1 %v2559_v33 }
   0xe   :  { %v2542_v37 = vld [vmem:[%s5563_s1 + $0x180] sm:$0xf]  ;;  %v3550_v39 = vld [vmem:[%s5563_s1 + $0x18c] sm:$0xf0]  ;;  %v2415_v44 = vor.u32 %v3518_v36, %v2414_v35  ;;  %1610 = vmatpush.bf16.msra.mxu2 %v2687_v34 }
   0xf   :  { %v2670_v40 = vld [vmem:[%s5563_s1 + $0x280] sm:$0xf]  ;;  %v3582_v41 = vld [vmem:[%s5563_s1 + $0x28c] sm:$0xf0]  ;;  %v2543_v45 = vor.u32 %v3550_v39, %v2542_v37  ;;  %1623 = vmatpush.bf16.msra.mxu3 %v2815_v38 }
  0x10   :  { %v2798_v42 = vld [vmem:[%s5563_s1 + $0x380] sm:$0xf]  ;;  %v3614_v43 = vld [vmem:[%s5563_s1 + $0x38c] sm:$0xf0]  ;;  %v2671_v46 = vor.u32 %v3582_v41, %v2670_v40  ;;  %1585 = vmatpush.bf16.msra.mxu0 %v2415_v44 }
  0x11   :  { %v2398_v47 = vld [vmem:[%s5563_s1 + $0x60] sm:$0xf]  ;;  %v3514_v48 = vld [vmem:[%s5563_s1 + $0x6c] sm:$0xf0]  ;;  %v2799_v50 = vor.u32 %v3614_v43, %v2798_v42  ;;  %1598 = vmatpush.bf16.msra.mxu1 %v2543_v45 }
  0x12   :  { %v2526_v49 = vld [vmem:[%s5563_s1 + $0x160] sm:$0xf]  ;;  %v3546_v51 = vld [vmem:[%s5563_s1 + $0x16c] sm:$0xf0]  ;;  %v2399_v56 = vor.u32 %v3514_v48, %v2398_v47  ;;  %1611 = vmatpush.bf16.msra.mxu2 %v2671_v46 }
  0x13   :  { %v2654_v52 = vld [vmem:[%s5563_s1 + $0x260] sm:$0xf]  ;;  %v3578_v53 = vld [vmem:[%s5563_s1 + $0x26c] sm:$0xf0]  ;;  %v2527_v57 = vor.u32 %v3546_v51, %v2526_v49  ;;  %1624 = vmatpush.bf16.msra.mxu3 %v2799_v50 }
  0x14   :  { %v2782_v54 = vld [vmem:[%s5563_s1 + $0x360] sm:$0xf]  ;;  %v3610_v55 = vld [vmem:[%s5563_s1 + $0x36c] sm:$0xf0]  ;;  %v2655_v58 = vor.u32 %v3578_v53, %v2654_v52  ;;  %1586 = vmatpush.bf16.msra.mxu0 %v2399_v56 }
  0x15   :  { %v2382_v59 = vld [vmem:[%s5563_s1 + $0x40] sm:$0xf]  ;;  %v3510_v60 = vld [vmem:[%s5563_s1 + $0x4c] sm:$0xf0]  ;;  %v2783_v62 = vor.u32 %v3610_v55, %v2782_v54  ;;  %1599 = vmatpush.bf16.msra.mxu1 %v2527_v57 }
  0x16   :  { %v2510_v61 = vld [vmem:[%s5563_s1 + $0x140] sm:$0xf]  ;;  %v3542_v63 = vld [vmem:[%s5563_s1 + $0x14c] sm:$0xf0]  ;;  %v2383_v4 = vor.u32 %v3510_v60, %v2382_v59  ;;  %1612 = vmatpush.bf16.msra.mxu2 %v2655_v58 }
  0x17   :  { %v2638_v0 = vld [vmem:[%s5563_s1 + $0x240] sm:$0xf]  ;;  %v3574_v1 = vld [vmem:[%s5563_s1 + $0x24c] sm:$0xf0]  ;;  %v2511_v5 = vor.u32 %v3542_v63, %v2510_v61  ;;  %1625 = vmatpush.bf16.msra.mxu3 %v2783_v62 }
  0x18   :  { %v2766_v2 = vld [vmem:[%s5563_s1 + $0x340] sm:$0xf]  ;;  %v3606_v3 = vld [vmem:[%s5563_s1 + $0x34c] sm:$0xf0]  ;;  %v2639_v6 = vor.u32 %v3574_v1, %v2638_v0  ;;  %1587 = vmatpush.bf16.msra.mxu0 %v2383_v4 }
  0x19   :  { %v2366_v7 = vld [vmem:[%s5563_s1 + $0x20] sm:$0xf]  ;;  %v3506_v8 = vld [vmem:[%s5563_s1 + $0x2c] sm:$0xf0]  ;;  %v2767_v10 = vor.u32 %v3606_v3, %v2766_v2  ;;  %1600 = vmatpush.bf16.msra.mxu1 %v2511_v5 }
  0x1a   :  { %v2494_v9 = vld [vmem:[%s5563_s1 + $0x120] sm:$0xf]  ;;  %v3538_v11 = vld [vmem:[%s5563_s1 + $0x12c] sm:$0xf0]  ;;  %v2367_v16 = vor.u32 %v3506_v8, %v2366_v7  ;;  %1613 = vmatpush.bf16.msra.mxu2 %v2639_v6 }
  0x1b   :  { %v2622_v12 = vld [vmem:[%s5563_s1 + $0x220] sm:$0xf]  ;;  %v3570_v13 = vld [vmem:[%s5563_s1 + $0x22c] sm:$0xf0]  ;;  %v2495_v19 = vor.u32 %v3538_v11, %v2494_v9  ;;  %1626 = vmatpush.bf16.msra.mxu3 %v2767_v10  ;;  %v23_v10 = vld [vmem:[%s5564_s0 + $0x18] sm:$0xff] }
  0x1c   :  { %v2750_v14 = vld [vmem:[%s5563_s1 + $0x320] sm:$0xf]  ;;  %v3602_v15 = vld [vmem:[%s5563_s1 + $0x32c] sm:$0xf0]  ;;  %v2623_v20 = vor.u32 %v3570_v13, %v2622_v12  ;;  %1588 = vmatpush.bf16.msra.mxu0 %v2367_v16 }
  0x1d   :  { %v2350_v17 = vld [vmem:[%s5563_s1] sm:$0xf]  ;;  %v3502_v18 = vld [vmem:[%s5563_s1 + $0xc] sm:$0xf0]  ;;  %v2751_v24 = vor.u32 %v3602_v15, %v2750_v14  ;;  %1601 = vmatpush.bf16.msra.mxu1 %v2495_v19  ;;  %v4118_v15 = vpack.c.bf16 %v23_v10, %v23_v10  ;;  %v21_v19 = vld [vmem:[%s5564_s0 + $0x8] sm:$0xff] }
  0x1e   :  { %v2478_v21 = vld [vmem:[%s5563_s1 + $0x100] sm:$0xf]  ;;  %v3534_v22 = vld [vmem:[%s5563_s1 + $0x10c] sm:$0xf0]  ;;  %v2351_v31 = vor.u32 %v3502_v18, %v2350_v17  ;;  %1614 = vmatpush.bf16.msra.mxu2 %v2623_v20  ;;  %v2592_v10 = vld [vmem:[%s5563_s1 + $0x1f0] sm:$0xf0] }
  0x1f   :  { %v2606_v23 = vld [vmem:[%s5563_s1 + $0x200] sm:$0xf]  ;;  %v3566_v25 = vld [vmem:[%s5563_s1 + $0x20c] sm:$0xf0]  ;;  %v2479_v35 = vor.u32 %v3534_v22, %v2478_v21  ;;  %1627 = vmatpush.bf16.msra.mxu3 %v2751_v24 }
  0x20   :  { %v2734_v26 = vld [vmem:[%s5563_s1 + $0x300] sm:$0xf]  ;;  %v3598_v27 = vld [vmem:[%s5563_s1 + $0x30c] sm:$0xf0]  ;;  %v2607_v36 = vor.u32 %v3566_v25, %v2606_v23  ;;  %1589 = vmatpush.bf16.msra.mxu0 %v2351_v31  ;;  %v4141_v25 = vpack.c.bf16 %v21_v19, %v21_v19 }
  0x21   :  { %v2974_v28 = vld [vmem:[%s5563_s1 + $0x4e0] sm:$0xf]  ;;  %v3658_v29 = vld [vmem:[%s5563_s1 + $0x4ec] sm:$0xf0]  ;;  %v2735_v39 = vor.u32 %v3598_v27, %v2734_v26  ;;  %1602 = vmatpush.bf16.msra.mxu1 %v2479_v35 }
  0x22   :  { %v3102_v30 = vld [vmem:[%s5563_s1 + $0x5e0] sm:$0xf]  ;;  %v3690_v32 = vld [vmem:[%s5563_s1 + $0x5ec] sm:$0xf0]  ;;  %v2975_v40 = vor.u32 %v3658_v29, %v2974_v28  ;;  %1615 = vmatpush.bf16.msra.mxu2 %v2607_v36 }
  0x23   :  { %v3230_v33 = vld [vmem:[%s5563_s1 + $0x6e0] sm:$0xf]  ;;  %v3722_v34 = vld [vmem:[%s5563_s1 + $0x6ec] sm:$0xf0]  ;;  %v3103_v41 = vor.u32 %v3690_v32, %v3102_v30  ;;  %1628 = vmatpush.bf16.msra.mxu3 %v2735_v39 }
  0x24   :  { %v3358_v37 = vld [vmem:[%s5563_s1 + $0x7e0] sm:$0xf]  ;;  %v3754_v38 = vld [vmem:[%s5563_s1 + $0x7ec] sm:$0xf0]  ;;  %v3231_v42 = vor.u32 %v3722_v34, %v3230_v33  ;;  %1634 = vmatpush.bf16.msrb.mxu0 %v2975_v40  ;;  %1603 = vmatmul.bf16.vlgmr.msra.gmra.mxu1 %v4141_v25 }
  0x25   :  { %v2958_v43 = vld [vmem:[%s5563_s1 + $0x4c0] sm:$0xf]  ;;  %v3654_v44 = vld [vmem:[%s5563_s1 + $0x4cc] sm:$0xf0]  ;;  %v3359_v46 = vor.u32 %v3754_v38, %v3358_v37  ;;  %1647 = vmatpush.bf16.msrb.mxu1 %v3103_v41 }
  0x26   :  { %v3086_v45 = vld [vmem:[%s5563_s1 + $0x5c0] sm:$0xf]  ;;  %v3686_v47 = vld [vmem:[%s5563_s1 + $0x5cc] sm:$0xf0]  ;;  %v2959_v52 = vor.u32 %v3654_v44, %v2958_v43  ;;  %1660 = vmatpush.bf16.msrb.mxu2 %v3231_v42  ;;  %1629 = vmatmul.bf16.vlgmr.msra.gmra.mxu3 %v4118_v15 }
  0x27   :  { %v3214_v48 = vld [vmem:[%s5563_s1 + $0x6c0] sm:$0xf]  ;;  %v3718_v49 = vld [vmem:[%s5563_s1 + $0x6cc] sm:$0xf0]  ;;  %v3087_v54 = vor.u32 %v3686_v47, %v3086_v45  ;;  %1673 = vmatpush.bf16.msrb.mxu3 %v3359_v46 }
  0x28   :  { %v3342_v50 = vld [vmem:[%s5563_s1 + $0x7c0] sm:$0xf]  ;;  %v3750_v51 = vld [vmem:[%s5563_s1 + $0x7cc] sm:$0xf0]  ;;  %v3215_v55 = vor.u32 %v3718_v49, %v3214_v48  ;;  %1635 = vmatpush.bf16.msrb.mxu0 %v2959_v52 }
  0x29   :  { %v2942_v53 = vld [vmem:[%s5563_s1 + $0x4a0] sm:$0xf]  ;;  %v3650_v56 = vld [vmem:[%s5563_s1 + $0x4ac] sm:$0xf0]  ;;  %v3343_v59 = vor.u32 %v3750_v51, %v3342_v50  ;;  %1648 = vmatpush.bf16.msrb.mxu1 %v3087_v54 }
  0x2a   :  { %v3070_v57 = vld [vmem:[%s5563_s1 + $0x5a0] sm:$0xf]  ;;  %v3682_v58 = vld [vmem:[%s5563_s1 + $0x5ac] sm:$0xf0]  ;;  %v2943_v0 = vor.u32 %v3650_v56, %v2942_v53  ;;  %1661 = vmatpush.bf16.msrb.mxu2 %v3215_v55 }
  0x2b   :  { %v3198_v60 = vld [vmem:[%s5563_s1 + $0x6a0] sm:$0xf]  ;;  %v3714_v61 = vld [vmem:[%s5563_s1 + $0x6ac] sm:$0xf0]  ;;  %v3071_v1 = vor.u32 %v3682_v58, %v3070_v57  ;;  %1674 = vmatpush.bf16.msrb.mxu3 %v3343_v59 }
  0x2c   :  { %v3326_v62 = vld [vmem:[%s5563_s1 + $0x7a0] sm:$0xf]  ;;  %v3746_v63 = vld [vmem:[%s5563_s1 + $0x7ac] sm:$0xf0]  ;;  %v3199_v5 = vor.u32 %v3714_v61, %v3198_v60  ;;  %1636 = vmatpush.bf16.msrb.mxu0 %v2943_v0 }
  0x2d   :  { %v2926_v2 = vld [vmem:[%s5563_s1 + $0x480] sm:$0xf]  ;;  %v22_v3 = vld [vmem:[%s5564_s0 + $0x10] sm:$0xff]  ;;  %v3327_v11 = vor.u32 %v3746_v63, %v3326_v62  ;;  %1649 = vmatpush.bf16.msrb.mxu1 %v3071_v1 }
  0x2e   :  { %v20_v4 = vld [vmem:[%s5564_s0] sm:$0xff]  ;;  %v3646_v6 = vld [vmem:[%s5563_s1 + $0x48c] sm:$0xf0]  ;;  %v4102_v8 = vpack.c.bf16 %v22_v3, %v22_v3  ;;  %1662 = vmatpush.bf16.msrb.mxu2 %v3199_v5  ;;  %v2464_v5 = vld [vmem:[%s5563_s1 + $0xf0] sm:$0xf0] }
  0x2f   :  { %v3054_v7 = vld [vmem:[%s5563_s1 + $0x580] sm:$0xf]  ;;  %v4104_v9 = vpack.c.bf16 %v20_v4, %v20_v4  ;;  %v3678_v12 = vld [vmem:[%s5563_s1 + $0x58c] sm:$0xf0]  ;;  %v2927_v18 = vor.u32 %v3646_v6, %v2926_v2  ;;  %1675 = vmatpush.bf16.msrb.mxu3 %v3327_v11  ;;  %v3528_v4 = vld [vmem:[%s5563_s1 + $0xe4] sm:$0xf] }
  0x30   :  { %v3182_v13 = vld [vmem:[%s5563_s1 + $0x680] sm:$0xf]  ;;  %v3710_v14 = vld [vmem:[%s5563_s1 + $0x68c] sm:$0xf0]  ;;  %1616 = vmatmul.bf16.vlgmr.msra.gmra.mxu2 %v4102_v8  ;;  %v3055_v20 = vor.u32 %v3678_v12, %v3054_v7  ;;  %v3560_v6 = vld [vmem:[%s5563_s1 + $0x1e4] sm:$0xf] }
  0x31   :  { %v3310_v16 = vld [vmem:[%s5563_s1 + $0x780] sm:$0xf]  ;;  %v3742_v17 = vld [vmem:[%s5563_s1 + $0x78c] sm:$0xf0]  ;;  %1590 = vmatmul.bf16.vlgmr.msra.gmra.mxu0 %v4104_v9  ;;  %v3183_v21 = vor.u32 %v3710_v14, %v3182_v13  ;;  %v3592_v11 = vld [vmem:[%s5563_s1 + $0x2e4] sm:$0xf] }
  0x32   :  { %v2910_v22 = vld [vmem:[%s5563_s1 + $0x460] sm:$0xf]  ;;  %v3642_v23 = vld [vmem:[%s5563_s1 + $0x46c] sm:$0xf0]  ;;  %v3311_v26 = vor.u32 %v3742_v17, %v3310_v16  ;;  %1637 = vmatpush.bf16.msrb.mxu0 %v2927_v18  ;;  %1650 = vmatpush.bf16.msrb.mxu1 %v3055_v20  ;;  %v2720_v12 = vld [vmem:[%s5563_s1 + $0x2f0] sm:$0xf0]  ;;  %v2467_v20 = vor.u32 %v3528_v4, %v2464_v5 }
  0x33   :  { %v3038_v24 = vld [vmem:[%s5563_s1 + $0x560] sm:$0xf]  ;;  %v3674_v27 = vld [vmem:[%s5563_s1 + $0x56c] sm:$0xf0]  ;;  %v2911_v32 = vor.u32 %v3642_v23, %v2910_v22  ;;  %1663 = vmatpush.bf16.msrb.mxu2 %v3183_v21  ;;  %v3624_v16 = vld [vmem:[%s5563_s1 + $0x3e4] sm:$0xf] }
  0x34   :  { %v3166_v28 = vld [vmem:[%s5563_s1 + $0x660] sm:$0xf]  ;;  %v3706_v29 = vld [vmem:[%s5563_s1 + $0x66c] sm:$0xf0]  ;;  %v3039_v33 = vor.u32 %v3674_v27, %v3038_v24  ;;  %1676 = vmatpush.bf16.msrb.mxu3 %v3311_v26  ;;  %v2848_v17 = vld [vmem:[%s5563_s1 + $0x3f0] sm:$0xf0]  ;;  %v2595_v24 = vor.u32 %v3560_v6, %v2592_v10  ;;  %v2723_v26 = vor.u32 %v3592_v11, %v2720_v12 }
  0x35   :  { %v3294_v30 = vld [vmem:[%s5563_s1 + $0x760] sm:$0xf]  ;;  %v3738_v31 = vld [vmem:[%s5563_s1 + $0x76c] sm:$0xf0]  ;;  %v3167_v34 = vor.u32 %v3706_v29, %v3166_v28  ;;  %v3524_v21 = vld [vmem:[%s5563_s1 + $0xc4] sm:$0xf] }
  0x36   :  { %v2894_v35 = vld [vmem:[%s5563_s1 + $0x440] sm:$0xf]  ;;  %v3638_v36 = vld [vmem:[%s5563_s1 + $0x44c] sm:$0xf0]  ;;  %v3295_v38 = vor.u32 %v3738_v31, %v3294_v30  ;;  %1638 = vmatpush.bf16.msrb.mxu0 %v2911_v32  ;;  %1651 = vmatpush.bf16.msrb.mxu1 %v3039_v33  ;;  %v27_v23 = vld [vmem:[%s5564_s0 + $0x38] sm:$0xff]  ;;  %v2851_v30 = vor.u32 %v3624_v16, %v2848_v17 }
  0x37   :  { %v3022_v37 = vld [vmem:[%s5563_s1 + $0x540] sm:$0xf]  ;;  %v3670_v39 = vld [vmem:[%s5563_s1 + $0x54c] sm:$0xf0]  ;;  %v2895_v44 = vor.u32 %v3638_v36, %v2894_v35  ;;  %1664 = vmatpush.bf16.msrb.mxu2 %v3167_v34  ;;  %v2448_v27 = vld [vmem:[%s5563_s1 + $0xd0] sm:$0xf0] }
  0x38   :  { %v3150_v40 = vld [vmem:[%s5563_s1 + $0x640] sm:$0xf]  ;;  %v3702_v41 = vld [vmem:[%s5563_s1 + $0x64c] sm:$0xf0]  ;;  %v3023_v45 = vor.u32 %v3670_v39, %v3022_v37  ;;  %1677 = vmatpush.bf16.msrb.mxu3 %v3295_v38  ;;  %v3556_v28 = vld [vmem:[%s5563_s1 + $0x1c4] sm:$0xf]  ;;  %v4295_v38 = vpack.c.bf16 %v27_v23, %v27_v23  ;;  %v2451_v39 = vor.u32 %v3524_v21, %v2448_v27 }
  0x39   :  { %v3278_v42 = vld [vmem:[%s5563_s1 + $0x740] sm:$0xf]  ;;  %v3734_v43 = vld [vmem:[%s5563_s1 + $0x74c] sm:$0xf0]  ;;  %v3151_v46 = vor.u32 %v3702_v41, %v3150_v40  ;;  %v25_v29 = vld [vmem:[%s5564_s0 + $0x28] sm:$0xff] }
  0x3a   :  { %v2878_v47 = vld [vmem:[%s5563_s1 + $0x420] sm:$0xf]  ;;  %v3634_v48 = vld [vmem:[%s5563_s1 + $0x42c] sm:$0xf0]  ;;  %v3279_v50 = vor.u32 %v3734_v43, %v3278_v42  ;;  %1639 = vmatpush.bf16.msrb.mxu0 %v2895_v44  ;;  %1652 = vmatpush.bf16.msrb.mxu1 %v3023_v45  ;;  %v2576_v31 = vld [vmem:[%s5563_s1 + $0x1d0] sm:$0xf0]  ;;  %v4297_v40 = vpack.c.bf16 %v25_v29, %v25_v29 }
  0x3b   :  { %v3006_v49 = vld [vmem:[%s5563_s1 + $0x520] sm:$0xf]  ;;  %v3666_v51 = vld [vmem:[%s5563_s1 + $0x52c] sm:$0xf0]  ;;  %v2879_v56 = vor.u32 %v3634_v48, %v2878_v47  ;;  %1665 = vmatpush.bf16.msrb.mxu2 %v3151_v46  ;;  %v3588_v32 = vld [vmem:[%s5563_s1 + $0x2c4] sm:$0xf]  ;;  %v2579_v41 = vor.u32 %v3556_v28, %v2576_v31 }
  0x3c   :  { %v3134_v52 = vld [vmem:[%s5563_s1 + $0x620] sm:$0xf]  ;;  %v3698_v53 = vld [vmem:[%s5563_s1 + $0x62c] sm:$0xf0]  ;;  %v3007_v59 = vor.u32 %v3666_v51, %v3006_v49  ;;  %1678 = vmatpush.bf16.msrb.mxu3 %v3279_v50  ;;  %v2704_v33 = vld [vmem:[%s5563_s1 + $0x2d0] sm:$0xf0] }
  0x3d   :  { %v3262_v54 = vld [vmem:[%s5563_s1 + $0x720] sm:$0xf]  ;;  %v3730_v55 = vld [vmem:[%s5563_s1 + $0x72c] sm:$0xf0]  ;;  %v3135_v60 = vor.u32 %v3698_v53, %v3134_v52  ;;  %v3620_v35 = vld [vmem:[%s5563_s1 + $0x3c4] sm:$0xf]  ;;  %v2707_v42 = vor.u32 %v3588_v32, %v2704_v33 }
  0x3e   :  { %v2862_v57 = vld [vmem:[%s5563_s1 + $0x400] sm:$0xf]  ;;  %v3630_v58 = vld [vmem:[%s5563_s1 + $0x40c] sm:$0xf0]  ;;  %v3263_v0 = vor.u32 %v3730_v55, %v3262_v54  ;;  %1640 = vmatpush.bf16.msrb.mxu0 %v2879_v56  ;;  %1653 = vmatpush.bf16.msrb.mxu1 %v3007_v59  ;;  %v2832_v36 = vld [vmem:[%s5563_s1 + $0x3d0] sm:$0xf0] }
  0x3f   :  { %v2990_v61 = vld [vmem:[%s5563_s1 + $0x500] sm:$0xf]  ;;  %v3662_v62 = vld [vmem:[%s5563_s1 + $0x50c] sm:$0xf0]  ;;  %v2863_v7 = vor.u32 %v3630_v58, %v2862_v57  ;;  %1666 = vmatpush.bf16.msrb.mxu2 %v3135_v60  ;;  %v3520_v43 = vld [vmem:[%s5563_s1 + $0xa4] sm:$0xf]  ;;  %v2835_v46 = vor.u32 %v3620_v35, %v2832_v36 }
  0x40   :  { %v3118_v63 = vld [vmem:[%s5563_s1 + $0x600] sm:$0xf]  ;;  %v3694_v1 = vld [vmem:[%s5563_s1 + $0x60c] sm:$0xf0]  ;;  %v2991_v13 = vor.u32 %v3662_v62, %v2990_v61  ;;  %1679 = vmatpush.bf16.msrb.mxu3 %v3263_v0  ;;  %v2432_v44 = vld [vmem:[%s5563_s1 + $0xb0] sm:$0xf0] }
  0x41   :  { %v3246_v2 = vld [vmem:[%s5563_s1 + $0x700] sm:$0xf]  ;;  %v3726_v3 = vld [vmem:[%s5563_s1 + $0x70c] sm:$0xf0]  ;;  %v3119_v14 = vor.u32 %v3694_v1, %v3118_v63  ;;  %v3552_v45 = vld [vmem:[%s5563_s1 + $0x1a4] sm:$0xf]  ;;  %v2435_v52 = vor.u32 %v3520_v43, %v2432_v44 }
  0x42   :  { %v26_v18 = vld [vmem:[%s5564_s0 + $0x30] sm:$0xff]  ;;  %v3247_v19 = vor.u32 %v3726_v3, %v3246_v2  ;;  %v24_v22 = vld [vmem:[%s5564_s0 + $0x20] sm:$0xff]  ;;  %1641 = vmatpush.bf16.msrb.mxu0 %v2863_v7  ;;  %1654 = vmatpush.bf16.msrb.mxu1 %v2991_v13 }
  0x43   :  { %v4285_v34 = vpack.c.bf16 %v26_v18, %v26_v18  ;;  %1667 = vmatpush.bf16.msrb.mxu2 %v3119_v14  ;;  %v4293_v37 = vpack.c.bf16 %v24_v22, %v24_v22  ;;  %v2560_v47 = vld [vmem:[%s5563_s1 + $0x1b0] sm:$0xf0]  ;;  %v3584_v48 = vld [vmem:[%s5563_s1 + $0x2a4] sm:$0xf] }
  0x44   :  { %1680 = vmatpush.bf16.msrb.mxu3 %v3247_v19  ;;  %v2688_v49 = vld [vmem:[%s5563_s1 + $0x2b0] sm:$0xf0]  ;;  %v3616_v50 = vld [vmem:[%s5563_s1 + $0x3a4] sm:$0xf]  ;;  %v2563_v53 = vor.u32 %v3552_v45, %v2560_v47 }
  0x45   :  { %v2816_v51 = vld [vmem:[%s5563_s1 + $0x3b0] sm:$0xf0]  ;;  %1642 = vmatmul.bf16.vlgmr.msrb.gmra.mxu0 %v4293_v37  ;;  %1655 = vmatmul.bf16.vlgmr.msrb.gmra.mxu1 %v4297_v40  ;;  %v2691_v54 = vor.u32 %v3584_v48, %v2688_v49  ;;  %v3516_v55 = vld [vmem:[%s5563_s1 + $0x84] sm:$0xf] }
  0x46   :  { %1686 = vmatpush.bf16.msra.mxu0 %v2467_v20  ;;  %1699 = vmatpush.bf16.msra.mxu1 %v2595_v24  ;;  %v2416_v56 = vld [vmem:[%s5563_s1 + $0x90] sm:$0xf0]  ;;  %v3548_v57 = vld [vmem:[%s5563_s1 + $0x184] sm:$0xf]  ;;  %v2819_v58 = vor.u32 %v3616_v50, %v2816_v51 }
  0x47   :  { %1712 = vmatpush.bf16.msra.mxu2 %v2723_v26  ;;  %1681 = vmatmul.bf16.vlgmr.msrb.gmra.mxu3 %v4295_v38  ;;  %v2544_v59 = vld [vmem:[%s5563_s1 + $0x190] sm:$0xf0]  ;;  %v3580_v60 = vld [vmem:[%s5563_s1 + $0x284] sm:$0xf]  ;;  %v2419_v0 = vor.u32 %v3516_v55, %v2416_v56 }
  0x48   :  { %1725 = vmatpush.bf16.msra.mxu3 %v2851_v30  ;;  %1668 = vmatmul.bf16.vlgmr.msrb.gmra.mxu2 %v4285_v34  ;;  %v2672_v61 = vld [vmem:[%s5563_s1 + $0x290] sm:$0xf0]  ;;  %v3612_v62 = vld [vmem:[%s5563_s1 + $0x384] sm:$0xf]  ;;  %v2547_v1 = vor.u32 %v3548_v57, %v2544_v59 }
  0x49   :  { %v2800_v63 = vld [vmem:[%s5563_s1 + $0x390] sm:$0xf0]  ;;  %v2675_v2 = vor.u32 %v3580_v60, %v2672_v61  ;;  %v3512_v3 = vld [vmem:[%s5563_s1 + $0x64] sm:$0xf] }
  0x4a   :  { %1687 = vmatpush.bf16.msra.mxu0 %v2451_v39  ;;  %1700 = vmatpush.bf16.msra.mxu1 %v2579_v41  ;;  %v2400_v4 = vld [vmem:[%s5563_s1 + $0x70] sm:$0xf0]  ;;  %v3544_v5 = vld [vmem:[%s5563_s1 + $0x164] sm:$0xf]  ;;  %v2803_v6 = vor.u32 %v3612_v62, %v2800_v63 }
  0x4b   :  { %1713 = vmatpush.bf16.msra.mxu2 %v2707_v42  ;;  %v2528_v7 = vld [vmem:[%s5563_s1 + $0x170] sm:$0xf0]  ;;  %v3576_v10 = vld [vmem:[%s5563_s1 + $0x264] sm:$0xf]  ;;  %v2403_v14 = vor.u32 %v3512_v3, %v2400_v4 }
  0x4c   :  { %1726 = vmatpush.bf16.msra.mxu3 %v2835_v46  ;;  %v2656_v11 = vld [vmem:[%s5563_s1 + $0x270] sm:$0xf0]  ;;  %v3608_v12 = vld [vmem:[%s5563_s1 + $0x364] sm:$0xf]  ;;  %v2531_v16 = vor.u32 %v3544_v5, %v2528_v7 }
  0x4d   :  { %v2784_v13 = vld [vmem:[%s5563_s1 + $0x370] sm:$0xf0]  ;;  %v2659_v17 = vor.u32 %v3576_v10, %v2656_v11  ;;  %v3508_v18 = vld [vmem:[%s5563_s1 + $0x44] sm:$0xf] }
  0x4e   :  { %1688 = vmatpush.bf16.msra.mxu0 %v2435_v52  ;;  %1701 = vmatpush.bf16.msra.mxu1 %v2563_v53  ;;  %v2384_v19 = vld [vmem:[%s5563_s1 + $0x50] sm:$0xf0]  ;;  %v3540_v20 = vld [vmem:[%s5563_s1 + $0x144] sm:$0xf]  ;;  %v2787_v21 = vor.u32 %v3608_v12, %v2784_v13 }
  0x4f   :  { %1714 = vmatpush.bf16.msra.mxu2 %v2691_v54  ;;  %v2512_v22 = vld [vmem:[%s5563_s1 + $0x150] sm:$0xf0]  ;;  %v3572_v23 = vld [vmem:[%s5563_s1 + $0x244] sm:$0xf]  ;;  %v2387_v28 = vor.u32 %v3508_v18, %v2384_v19 }
  0x50   :  { %1727 = vmatpush.bf16.msra.mxu3 %v2819_v58  ;;  %v2640_v24 = vld [vmem:[%s5563_s1 + $0x250] sm:$0xf0]  ;;  %v3604_v26 = vld [vmem:[%s5563_s1 + $0x344] sm:$0xf]  ;;  %v2515_v29 = vor.u32 %v3540_v20, %v2512_v22 }
  0x51   :  { %v2768_v27 = vld [vmem:[%s5563_s1 + $0x350] sm:$0xf0]  ;;  %v2643_v30 = vor.u32 %v3572_v23, %v2640_v24  ;;  %v3504_v31 = vld [vmem:[%s5563_s1 + $0x24] sm:$0xf] }
  0x52   :  { %1689 = vmatpush.bf16.msra.mxu0 %v2419_v0  ;;  %1702 = vmatpush.bf16.msra.mxu1 %v2547_v1  ;;  %v2368_v32 = vld [vmem:[%s5563_s1 + $0x30] sm:$0xf0]  ;;  %v3536_v33 = vld [vmem:[%s5563_s1 + $0x124] sm:$0xf]  ;;  %v2771_v35 = vor.u32 %v3604_v26, %v2768_v27 }
  0x53   :  { %1715 = vmatpush.bf16.msra.mxu2 %v2675_v2  ;;  %v2496_v36 = vld [vmem:[%s5563_s1 + $0x130] sm:$0xf0]  ;;  %v3568_v39 = vld [vmem:[%s5563_s1 + $0x224] sm:$0xf]  ;;  %v2371_v44 = vor.u32 %v3504_v31, %v2368_v32 }
  0x54   :  { %1728 = vmatpush.bf16.msra.mxu3 %v2803_v6  ;;  %v2624_v41 = vld [vmem:[%s5563_s1 + $0x230] sm:$0xf0]  ;;  %v3600_v42 = vld [vmem:[%s5563_s1 + $0x324] sm:$0xf]  ;;  %v2499_v47 = vor.u32 %v3536_v33, %v2496_v36 }
  0x55   :  { %v2752_v43 = vld [vmem:[%s5563_s1 + $0x330] sm:$0xf0]  ;;  %v3500_v45 = vld [vmem:[%s5563_s1 + $0x4] sm:$0xf]  ;;  %v2627_v48 = vor.u32 %v3568_v39, %v2624_v41 }
  0x56   :  { %1690 = vmatpush.bf16.msra.mxu0 %v2403_v14  ;;  %1703 = vmatpush.bf16.msra.mxu1 %v2531_v16  ;;  %v2352_v46 = vld [vmem:[%s5563_s1 + $0x10] sm:$0xf0]  ;;  %v3532_v49 = vld [vmem:[%s5563_s1 + $0x104] sm:$0xf]  ;;  %v2755_v52 = vor.u32 %v3600_v42, %v2752_v43 }
  0x57   :  { %1716 = vmatpush.bf16.msra.mxu2 %v2659_v17  ;;  %v2480_v50 = vld [vmem:[%s5563_s1 + $0x110] sm:$0xf0]  ;;  %v3564_v51 = vld [vmem:[%s5563_s1 + $0x204] sm:$0xf]  ;;  %v2355_v59 = vor.u32 %v3500_v45, %v2352_v46 }
  0x58   :  { %1729 = vmatpush.bf16.msra.mxu3 %v2787_v21  ;;  %v2608_v53 = vld [vmem:[%s5563_s1 + $0x210] sm:$0xf0]  ;;  %v3596_v54 = vld [vmem:[%s5563_s1 + $0x304] sm:$0xf]  ;;  %v2483_v63 = vor.u32 %v3532_v49, %v2480_v50 }
  0x59   :  { %v2736_v55 = vld [vmem:[%s5563_s1 + $0x310] sm:$0xf0]  ;;  %v3656_v56 = vld [vmem:[%s5563_s1 + $0x4e4] sm:$0xf]  ;;  %v2611_v0 = vor.u32 %v3564_v51, %v2608_v53 }
  0x5a   :  { %1691 = vmatpush.bf16.msra.mxu0 %v2387_v28  ;;  %1704 = vmatpush.bf16.msra.mxu1 %v2515_v29  ;;  %v2976_v57 = vld [vmem:[%s5563_s1 + $0x4f0] sm:$0xf0]  ;;  %v3688_v58 = vld [vmem:[%s5563_s1 + $0x5e4] sm:$0xf]  ;;  %v2739_v3 = vor.u32 %v3596_v54, %v2736_v55 }
  0x5b   :  { %1717 = vmatpush.bf16.msra.mxu2 %v2643_v30  ;;  %v3104_v60 = vld [vmem:[%s5563_s1 + $0x5f0] sm:$0xf0]  ;;  %v3720_v61 = vld [vmem:[%s5563_s1 + $0x6e4] sm:$0xf]  ;;  %v2979_v4 = vor.u32 %v3656_v56, %v2976_v57 }
  0x5c   :  { %1730 = vmatpush.bf16.msra.mxu3 %v2771_v35  ;;  %v3232_v62 = vld [vmem:[%s5563_s1 + $0x6f0] sm:$0xf0]  ;;  %v3752_v1 = vld [vmem:[%s5563_s1 + $0x7e4] sm:$0xf]  ;;  %v3107_v5 = vor.u32 %v3688_v58, %v3104_v60 }
  0x5d   :  { %v3360_v2 = vld [vmem:[%s5563_s1 + $0x7f0] sm:$0xf0]  ;;  %v3235_v6 = vor.u32 %v3720_v61, %v3232_v62  ;;  %v3652_v7 = vld [vmem:[%s5563_s1 + $0x4c4] sm:$0xf] }
  0x5e   :  { %1692 = vmatpush.bf16.msra.mxu0 %v2371_v44  ;;  %1705 = vmatpush.bf16.msra.mxu1 %v2499_v47  ;;  %v2960_v10 = vld [vmem:[%s5563_s1 + $0x4d0] sm:$0xf0]  ;;  %v3684_v11 = vld [vmem:[%s5563_s1 + $0x5c4] sm:$0xf]  ;;  %v3363_v12 = vor.u32 %v3752_v1, %v3360_v2 }
  0x5f   :  { %1718 = vmatpush.bf16.msra.mxu2 %v2627_v48  ;;  %v3088_v13 = vld [vmem:[%s5563_s1 + $0x5d0] sm:$0xf0]  ;;  %v3716_v14 = vld [vmem:[%s5563_s1 + $0x6c4] sm:$0xf]  ;;  %v2963_v19 = vor.u32 %v3652_v7, %v2960_v10 }
  0x60   :  { %1731 = vmatpush.bf16.msra.mxu3 %v2755_v52  ;;  %v3216_v16 = vld [vmem:[%s5563_s1 + $0x6d0] sm:$0xf0]  ;;  %v3748_v17 = vld [vmem:[%s5563_s1 + $0x7c4] sm:$0xf]  ;;  %v3091_v20 = vor.u32 %v3684_v11, %v3088_v13 }
  0x61   :  { %v3344_v18 = vld [vmem:[%s5563_s1 + $0x7d0] sm:$0xf0]  ;;  %v3219_v21 = vor.u32 %v3716_v14, %v3216_v16  ;;  %v3648_v22 = vld [vmem:[%s5563_s1 + $0x4a4] sm:$0xf] }
  0x62   :  { %1693 = vmatpush.bf16.msra.mxu0 %v2355_v59  ;;  %1706 = vmatpush.bf16.msra.mxu1 %v2483_v63  ;;  %v2944_v23 = vld [vmem:[%s5563_s1 + $0x4b0] sm:$0xf0]  ;;  %v3680_v24 = vld [vmem:[%s5563_s1 + $0x5a4] sm:$0xf]  ;;  %v3347_v26 = vor.u32 %v3748_v17, %v3344_v18 }
  0x63   :  { %1719 = vmatpush.bf16.msra.mxu2 %v2611_v0  ;;  %v3072_v27 = vld [vmem:[%s5563_s1 + $0x5b0] sm:$0xf0]  ;;  %v3712_v28 = vld [vmem:[%s5563_s1 + $0x6a4] sm:$0xf]  ;;  %v2947_v32 = vor.u32 %v3648_v22, %v2944_v23 }
  0x64   :  { %1732 = vmatpush.bf16.msra.mxu3 %v2739_v3  ;;  %v3200_v29 = vld [vmem:[%s5563_s1 + $0x6b0] sm:$0xf0]  ;;  %v3744_v30 = vld [vmem:[%s5563_s1 + $0x7a4] sm:$0xf]  ;;  %v3075_v33 = vor.u32 %v3680_v24, %v3072_v27 }
  0x65   :  { %v3328_v31 = vld [vmem:[%s5563_s1 + $0x7b0] sm:$0xf0]  ;;  %1694 = vmatmul.bf16.vlgmr.msra.gmra.mxu0 %v4104_v9  ;;  %1707 = vmatmul.bf16.vlgmr.msra.gmra.mxu1 %v4141_v25  ;;  %v3203_v35 = vor.u32 %v3712_v28, %v3200_v29  ;;  %v3644_v36 = vld [vmem:[%s5563_s1 + $0x484] sm:$0xf] }
  0x66   :  { %1738 = vmatpush.bf16.msrb.mxu0 %v2979_v4  ;;  %1751 = vmatpush.bf16.msrb.mxu1 %v3107_v5  ;;  %v2928_v39 = vld [vmem:[%s5563_s1 + $0x490] sm:$0xf0]  ;;  %v3676_v41 = vld [vmem:[%s5563_s1 + $0x584] sm:$0xf]  ;;  %v3331_v42 = vor.u32 %v3744_v30, %v3328_v31 }
  0x67   :  { %1764 = vmatpush.bf16.msrb.mxu2 %v3235_v6  ;;  %1733 = vmatmul.bf16.vlgmr.msra.gmra.mxu3 %v4118_v15  ;;  %v3056_v43 = vld [vmem:[%s5563_s1 + $0x590] sm:$0xf0]  ;;  %v3708_v44 = vld [vmem:[%s5563_s1 + $0x684] sm:$0xf]  ;;  %v2931_v48 = vor.u32 %v3644_v36, %v2928_v39  ;;  %v2470_v39 = vld [vmem:[%s5563_s1 + $0xe8] sm:$0xf] }
  0x68   :  { %1777 = vmatpush.bf16.msrb.mxu3 %v3363_v12  ;;  %1720 = vmatmul.bf16.vlgmr.msra.gmra.mxu2 %v4102_v8  ;;  %v3184_v45 = vld [vmem:[%s5563_s1 + $0x690] sm:$0xf0]  ;;  %v3740_v46 = vld [vmem:[%s5563_s1 + $0x784] sm:$0xf]  ;;  %v3059_v49 = vor.u32 %v3676_v41, %v3056_v43  ;;  %v3531_v41 = vld [vmem:[%s5563_s1 + $0xf4] sm:$0xf0] }
  0x69   :  { %v3312_v47 = vld [vmem:[%s5563_s1 + $0x790] sm:$0xf0]  ;;  %v3187_v50 = vor.u32 %v3708_v44, %v3184_v45  ;;  %v3640_v51 = vld [vmem:[%s5563_s1 + $0x464] sm:$0xf]  ;;  %v3563_v44 = vld [vmem:[%s5563_s1 + $0x1f4] sm:$0xf0] }
  0x6a   :  { %1739 = vmatpush.bf16.msrb.mxu0 %v2963_v19  ;;  %1752 = vmatpush.bf16.msrb.mxu1 %v3091_v20  ;;  %v2912_v52 = vld [vmem:[%s5563_s1 + $0x470] sm:$0xf0]  ;;  %v3672_v53 = vld [vmem:[%s5563_s1 + $0x564] sm:$0xf]  ;;  %v3315_v54 = vor.u32 %v3740_v46, %v3312_v47  ;;  %v2726_v45 = vld [vmem:[%s5563_s1 + $0x2e8] sm:$0xf] }
  0x6b   :  { %1765 = vmatpush.bf16.msrb.mxu2 %v3219_v21  ;;  %v3040_v55 = vld [vmem:[%s5563_s1 + $0x570] sm:$0xf0]  ;;  %v3704_v56 = vld [vmem:[%s5563_s1 + $0x664] sm:$0xf]  ;;  %v2915_v60 = vor.u32 %v3640_v51, %v2912_v52  ;;  %v3595_v46 = vld [vmem:[%s5563_s1 + $0x2f4] sm:$0xf0]  ;;  %v2471_v52 = vor.u32 %v3531_v41, %v2470_v39 }
  0x6c   :  { %1778 = vmatpush.bf16.msrb.mxu3 %v3347_v26  ;;  %v3168_v57 = vld [vmem:[%s5563_s1 + $0x670] sm:$0xf0]  ;;  %v3736_v58 = vld [vmem:[%s5563_s1 + $0x764] sm:$0xf]  ;;  %v3043_v61 = vor.u32 %v3672_v53, %v3040_v55  ;;  %v2454_v55 = vld [vmem:[%s5563_s1 + $0xc8] sm:$0xf] }
  0x6d   :  { %v3296_v59 = vld [vmem:[%s5563_s1 + $0x770] sm:$0xf0]  ;;  %v3171_v62 = vor.u32 %v3704_v56, %v3168_v57  ;;  %v3636_v63 = vld [vmem:[%s5563_s1 + $0x444] sm:$0xf]  ;;  %v3527_v56 = vld [vmem:[%s5563_s1 + $0xd4] sm:$0xf0] }
  0x6e   :  { %1740 = vmatpush.bf16.msrb.mxu0 %v2947_v32  ;;  %1753 = vmatpush.bf16.msrb.mxu1 %v3075_v33  ;;  %v2896_v0 = vld [vmem:[%s5563_s1 + $0x450] sm:$0xf0]  ;;  %v3668_v1 = vld [vmem:[%s5563_s1 + $0x544] sm:$0xf]  ;;  %v3299_v2 = vor.u32 %v3736_v58, %v3296_v59  ;;  %v2582_v57 = vld [vmem:[%s5563_s1 + $0x1c8] sm:$0xf] }
  0x6f   :  { %1766 = vmatpush.bf16.msrb.mxu2 %v3203_v35  ;;  %v3024_v3 = vld [vmem:[%s5563_s1 + $0x550] sm:$0xf0]  ;;  %v3700_v4 = vld [vmem:[%s5563_s1 + $0x644] sm:$0xf]  ;;  %v2899_v10 = vor.u32 %v3636_v63, %v2896_v0  ;;  %v3559_v59 = vld [vmem:[%s5563_s1 + $0x1d4] sm:$0xf0]  ;;  %v2455_v0 = vor.u32 %v3527_v56, %v2454_v55 }
  0x70   :  { %1779 = vmatpush.bf16.msrb.mxu3 %v3331_v42  ;;  %v3152_v5 = vld [vmem:[%s5563_s1 + $0x650] sm:$0xf0]  ;;  %v3732_v6 = vld [vmem:[%s5563_s1 + $0x744] sm:$0xf]  ;;  %v3027_v11 = vor.u32 %v3668_v1, %v3024_v3  ;;  %v2598_v42 = vld [vmem:[%s5563_s1 + $0x1e8] sm:$0xf]  ;;  %v2583_v1 = vor.u32 %v3559_v59, %v2582_v57 }
  0x71   :  { %v3280_v7 = vld [vmem:[%s5563_s1 + $0x750] sm:$0xf0]  ;;  %v3155_v12 = vor.u32 %v3700_v4, %v3152_v5  ;;  %v3632_v13 = vld [vmem:[%s5563_s1 + $0x424] sm:$0xf]  ;;  %v2599_v53 = vor.u32 %v3563_v44, %v2598_v42  ;;  %v3623_v63 = vld [vmem:[%s5563_s1 + $0x3d4] sm:$0xf0] }
  0x72   :  { %1741 = vmatpush.bf16.msrb.mxu0 %v2931_v48  ;;  %1754 = vmatpush.bf16.msrb.mxu1 %v3059_v49  ;;  %v2880_v14 = vld [vmem:[%s5563_s1 + $0x430] sm:$0xf0]  ;;  %v3664_v16 = vld [vmem:[%s5563_s1 + $0x524] sm:$0xf]  ;;  %v3283_v17 = vor.u32 %v3732_v6, %v3280_v7  ;;  %v2854_v49 = vld [vmem:[%s5563_s1 + $0x3e8] sm:$0xf] }
  0x73   :  { %1767 = vmatpush.bf16.msrb.mxu2 %v3187_v50  ;;  %v3008_v18 = vld [vmem:[%s5563_s1 + $0x530] sm:$0xf0]  ;;  %v3696_v19 = vld [vmem:[%s5563_s1 + $0x624] sm:$0xf]  ;;  %v2883_v23 = vor.u32 %v3632_v13, %v2880_v14  ;;  %v3627_v50 = vld [vmem:[%s5563_s1 + $0x3f4] sm:$0xf0] }
  0x74   :  { %1780 = vmatpush.bf16.msrb.mxu3 %v3315_v54  ;;  %v3136_v20 = vld [vmem:[%s5563_s1 + $0x630] sm:$0xf0]  ;;  %v3728_v21 = vld [vmem:[%s5563_s1 + $0x724] sm:$0xf]  ;;  %v3011_v27 = vor.u32 %v3664_v16, %v3008_v18  ;;  %v2727_v54 = vor.u32 %v3595_v46, %v2726_v45  ;;  %v2855_v58 = vor.u32 %v3627_v50, %v2854_v49  ;;  %v2438_v3 = vld [vmem:[%s5563_s1 + $0xa8] sm:$0xf] }
  0x75   :  { %v3264_v22 = vld [vmem:[%s5563_s1 + $0x730] sm:$0xf0]  ;;  %v3628_v24 = vld [vmem:[%s5563_s1 + $0x404] sm:$0xf]  ;;  %v3139_v28 = vor.u32 %v3696_v19, %v3136_v20  ;;  %v3523_v4 = vld [vmem:[%s5563_s1 + $0xb4] sm:$0xf0] }
  0x76   :  { %1742 = vmatpush.bf16.msrb.mxu0 %v2915_v60  ;;  %1755 = vmatpush.bf16.msrb.mxu1 %v3043_v61  ;;  %v2864_v26 = vld [vmem:[%s5563_s1 + $0x410] sm:$0xf0]  ;;  %v3660_v29 = vld [vmem:[%s5563_s1 + $0x504] sm:$0xf]  ;;  %v3267_v32 = vor.u32 %v3728_v21, %v3264_v22  ;;  %v2710_v60 = vld [vmem:[%s5563_s1 + $0x2c8] sm:$0xf]  ;;  %v2439_v14 = vor.u32 %v3523_v4, %v2438_v3 }
  0x77   :  { %1768 = vmatpush.bf16.msrb.mxu2 %v3171_v62  ;;  %v2992_v30 = vld [vmem:[%s5563_s1 + $0x510] sm:$0xf0]  ;;  %v3692_v31 = vld [vmem:[%s5563_s1 + $0x604] sm:$0xf]  ;;  %v2867_v43 = vor.u32 %v3628_v24, %v2864_v26  ;;  %v3591_v61 = vld [vmem:[%s5563_s1 + $0x2d4] sm:$0xf0] }
  0x78   :  { %1781 = vmatpush.bf16.msrb.mxu3 %v3299_v2  ;;  %v3120_v33 = vld [vmem:[%s5563_s1 + $0x610] sm:$0xf0]  ;;  %v3724_v35 = vld [vmem:[%s5563_s1 + $0x704] sm:$0xf]  ;;  %v2995_v47 = vor.u32 %v3660_v29, %v2992_v30  ;;  %v2838_v62 = vld [vmem:[%s5563_s1 + $0x3c8] sm:$0xf]  ;;  %v2711_v2 = vor.u32 %v3591_v61, %v2710_v60 }
  0x79   :  { %v3248_v36 = vld [vmem:[%s5563_s1 + $0x710] sm:$0xf0]  ;;  %v3123_v48 = vor.u32 %v3692_v31, %v3120_v33  ;;  %v2566_v5 = vld [vmem:[%s5563_s1 + $0x1a8] sm:$0xf]  ;;  %v2839_v6 = vor.u32 %v3623_v63, %v2838_v62  ;;  %v3555_v7 = vld [vmem:[%s5563_s1 + $0x1b4] sm:$0xf0] }
  0x7a   :  { %1743 = vmatpush.bf16.msrb.mxu0 %v2899_v10  ;;  %1756 = vmatpush.bf16.msrb.mxu1 %v3027_v11  ;;  %v3251_v51 = vor.u32 %v3724_v35, %v3248_v36  ;;  %v2694_v10 = vld [vmem:[%s5563_s1 + $0x2a8] sm:$0xf]  ;;  %v3587_v11 = vld [vmem:[%s5563_s1 + $0x2b4] sm:$0xf0]  ;;  %v2567_v16 = vor.u32 %v3555_v7, %v2566_v5 }
  0x7b   :  { %1769 = vmatpush.bf16.msrb.mxu2 %v3155_v12  ;;  %v2822_v12 = vld [vmem:[%s5563_s1 + $0x3a8] sm:$0xf]  ;;  %v3619_v13 = vld [vmem:[%s5563_s1 + $0x3b4] sm:$0xf0] }
  0x7c   :  { %1782 = vmatpush.bf16.msrb.mxu3 %v3283_v17  ;;  %v2695_v17 = vor.u32 %v3587_v11, %v2694_v10  ;;  %v2422_v18 = vld [vmem:[%s5563_s1 + $0x88] sm:$0xf]  ;;  %v3519_v19 = vld [vmem:[%s5563_s1 + $0x94] sm:$0xf0]  ;;  %v2823_v21 = vor.u32 %v3619_v13, %v2822_v12 }
  0x7d   :  { %v2550_v20 = vld [vmem:[%s5563_s1 + $0x188] sm:$0xf]  ;;  %v3551_v22 = vld [vmem:[%s5563_s1 + $0x194] sm:$0xf0] }
  0x7e   :  { %1744 = vmatpush.bf16.msrb.mxu0 %v2883_v23  ;;  %1757 = vmatpush.bf16.msrb.mxu1 %v3011_v27  ;;  %v2678_v23 = vld [vmem:[%s5563_s1 + $0x288] sm:$0xf]  ;;  %v3583_v24 = vld [vmem:[%s5563_s1 + $0x294] sm:$0xf0]  ;;  %v2551_v29 = vor.u32 %v3551_v22, %v2550_v20 }
  0x7f   :  { %1770 = vmatpush.bf16.msrb.mxu2 %v3139_v28  ;;  %v2806_v26 = vld [vmem:[%s5563_s1 + $0x388] sm:$0xf]  ;;  %v3615_v27 = vld [vmem:[%s5563_s1 + $0x394] sm:$0xf0]  ;;  %v2423_v28 = vor.u32 %v3519_v19, %v2422_v18  ;;  %v2679_v30 = vor.u32 %v3583_v24, %v2678_v23 }
  0x80   :  { %1783 = vmatpush.bf16.msrb.mxu3 %v3267_v32  ;;  %v2406_v31 = vld [vmem:[%s5563_s1 + $0x68] sm:$0xf]  ;;  %v3515_v32 = vld [vmem:[%s5563_s1 + $0x74] sm:$0xf0]  ;;  %v2807_v35 = vor.u32 %v3615_v27, %v2806_v26 }
  0x81   :  { %v2534_v33 = vld [vmem:[%s5563_s1 + $0x168] sm:$0xf]  ;;  %v3547_v36 = vld [vmem:[%s5563_s1 + $0x174] sm:$0xf0]  ;;  %v2407_v44 = vor.u32 %v3515_v32, %v2406_v31 }
  0x82   :  { %1745 = vmatpush.bf16.msrb.mxu0 %v2867_v43  ;;  %1758 = vmatpush.bf16.msrb.mxu1 %v2995_v47  ;;  %v2662_v39 = vld [vmem:[%s5563_s1 + $0x268] sm:$0xf]  ;;  %v3579_v41 = vld [vmem:[%s5563_s1 + $0x274] sm:$0xf0]  ;;  %v2535_v45 = vor.u32 %v3547_v36, %v2534_v33 }
  0x83   :  { %1771 = vmatpush.bf16.msrb.mxu2 %v3123_v48  ;;  %v2790_v42 = vld [vmem:[%s5563_s1 + $0x368] sm:$0xf]  ;;  %v3611_v43 = vld [vmem:[%s5563_s1 + $0x374] sm:$0xf0]  ;;  %v2663_v46 = vor.u32 %v3579_v41, %v2662_v39 }
  0x84   :  { %1784 = vmatpush.bf16.msrb.mxu3 %v3251_v51  ;;  %v2390_v47 = vld [vmem:[%s5563_s1 + $0x48] sm:$0xf]  ;;  %v3511_v48 = vld [vmem:[%s5563_s1 + $0x54] sm:$0xf0]  ;;  %v2791_v50 = vor.u32 %v3611_v43, %v2790_v42 }
  0x85   :  { %1746 = vmatmul.bf16.vlgmr.msrb.gmra.mxu0 %v4293_v37  ;;  %1759 = vmatmul.bf16.vlgmr.msrb.gmra.mxu1 %v4297_v40  ;;  %v2518_v49 = vld [vmem:[%s5563_s1 + $0x148] sm:$0xf]  ;;  %v3543_v51 = vld [vmem:[%s5563_s1 + $0x154] sm:$0xf0]  ;;  %v2391_v56 = vor.u32 %v3511_v48, %v2390_v47 }
  0x86   :  { %1790 = vmatpush.bf16.msra.mxu0 %v2471_v52  ;;  %1803 = vmatpush.bf16.msra.mxu1 %v2599_v53  ;;  %v2646_v52 = vld [vmem:[%s5563_s1 + $0x248] sm:$0xf]  ;;  %v3575_v53 = vld [vmem:[%s5563_s1 + $0x254] sm:$0xf0]  ;;  %v2519_v57 = vor.u32 %v3543_v51, %v2518_v49 }
  0x87   :  { %1816 = vmatpush.bf16.msra.mxu2 %v2727_v54  ;;  %1785 = vmatmul.bf16.vlgmr.msrb.gmra.mxu3 %v4295_v38  ;;  %v2774_v54 = vld [vmem:[%s5563_s1 + $0x348] sm:$0xf]  ;;  %v3607_v55 = vld [vmem:[%s5563_s1 + $0x354] sm:$0xf0] }
  0x88   :  { %1829 = vmatpush.bf16.msra.mxu3 %v2855_v58  ;;  %1772 = vmatmul.bf16.vlgmr.msrb.gmra.mxu2 %v4285_v34  ;;  %v2647_v58 = vor.u32 %v3575_v53, %v2646_v52  ;;  %v2374_v59 = vld [vmem:[%s5563_s1 + $0x28] sm:$0xf]  ;;  %v3507_v60 = vld [vmem:[%s5563_s1 + $0x34] sm:$0xf0]  ;;  %v2775_v62 = vor.u32 %v3607_v55, %v2774_v54 }
  0x89   :  { %v2502_v61 = vld [vmem:[%s5563_s1 + $0x128] sm:$0xf]  ;;  %v3539_v63 = vld [vmem:[%s5563_s1 + $0x134] sm:$0xf0]  ;;  %v2375_v4 = vor.u32 %v3507_v60, %v2374_v59 }
  0x8a   :  { %1791 = vmatpush.bf16.msra.mxu0 %v2455_v0  ;;  %1804 = vmatpush.bf16.msra.mxu1 %v2583_v1  ;;  %v2630_v0 = vld [vmem:[%s5563_s1 + $0x228] sm:$0xf]  ;;  %v3571_v1 = vld [vmem:[%s5563_s1 + $0x234] sm:$0xf0]  ;;  %v2503_v7 = vor.u32 %v3539_v63, %v2502_v61 }
  0x8b   :  { %1817 = vmatpush.bf16.msra.mxu2 %v2711_v2  ;;  %v2758_v2 = vld [vmem:[%s5563_s1 + $0x328] sm:$0xf]  ;;  %v3603_v3 = vld [vmem:[%s5563_s1 + $0x334] sm:$0xf0]  ;;  %v2631_v10 = vor.u32 %v3571_v1, %v2630_v0 }
  0x8c   :  { %1830 = vmatpush.bf16.msra.mxu3 %v2839_v6  ;;  %v2358_v5 = vld [vmem:[%s5563_s1 + $0x8] sm:$0xf]  ;;  %v3503_v6 = vld [vmem:[%s5563_s1 + $0x14] sm:$0xf0] }
  0x8d   :  { %v2486_v11 = vld [vmem:[%s5563_s1 + $0x108] sm:$0xf]  ;;  %v3535_v12 = vld [vmem:[%s5563_s1 + $0x114] sm:$0xf0]  ;;  %v2359_v22 = vor.u32 %v3503_v6, %v2358_v5  ;;  %v4936_v6 = vld [vmem:[%s5565_s2] sm:$0xf] }
  0x8e   :  { %1792 = vmatpush.bf16.msra.mxu0 %v2439_v14  ;;  %1805 = vmatpush.bf16.msra.mxu1 %v2567_v16  ;;  %v2614_v13 = vld [vmem:[%s5563_s1 + $0x208] sm:$0xf]  ;;  %v2759_v14 = vor.u32 %v3603_v3, %v2758_v2  ;;  %v3567_v16 = vld [vmem:[%s5563_s1 + $0x214] sm:$0xf0]  ;;  %v2487_v27 = vor.u32 %v3535_v12, %v2486_v11 }
  0x8f   :  { %1818 = vmatpush.bf16.msra.mxu2 %v2695_v17  ;;  %v2742_v17 = vld [vmem:[%s5563_s1 + $0x308] sm:$0xf]  ;;  %v3599_v18 = vld [vmem:[%s5563_s1 + $0x314] sm:$0xf0] }
  0x90   :  { %1831 = vmatpush.bf16.msra.mxu3 %v2823_v21  ;;  %v2982_v19 = vld [vmem:[%s5563_s1 + $0x4e8] sm:$0xf]  ;;  %v3659_v20 = vld [vmem:[%s5563_s1 + $0x4f4] sm:$0xf0]  ;;  %v2743_v31 = vor.u32 %v3599_v18, %v2742_v17  ;;  %v294_v18 = vperm.slane %v4936_v6, 0 }
  0x91   :  { %v3110_v21 = vld [vmem:[%s5563_s1 + $0x5e8] sm:$0xf]  ;;  %v3691_v23 = vld [vmem:[%s5563_s1 + $0x5f4] sm:$0xf0]  ;;  %v2983_v32 = vor.u32 %v3659_v20, %v2982_v19 }
  0x92   :  { %1793 = vmatpush.bf16.msra.mxu0 %v2423_v28  ;;  %1806 = vmatpush.bf16.msra.mxu1 %v2551_v29  ;;  %v3238_v24 = vld [vmem:[%s5563_s1 + $0x6e8] sm:$0xf]  ;;  %v3723_v26 = vld [vmem:[%s5563_s1 + $0x6f4] sm:$0xf0]  ;;  %v2615_v28 = vor.u32 %v3567_v16, %v2614_v13  ;;  %v3111_v33 = vor.u32 %v3691_v23, %v3110_v21 }
  0x93   :  { %1819 = vmatpush.bf16.msra.mxu2 %v2679_v30  ;;  %v3366_v29 = vld [vmem:[%s5563_s1 + $0x7e8] sm:$0xf]  ;;  %v3755_v30 = vld [vmem:[%s5563_s1 + $0x7f4] sm:$0xf0] }
  0x94   :  { %1832 = vmatpush.bf16.msra.mxu3 %v2807_v35  ;;  %v3239_v35 = vor.u32 %v3723_v26, %v3238_v24  ;;  %v2966_v36 = vld [vmem:[%s5563_s1 + $0x4c8] sm:$0xf]  ;;  %v3655_v39 = vld [vmem:[%s5563_s1 + $0x4d4] sm:$0xf0]  ;;  %v3367_v42 = vor.u32 %v3755_v30, %v3366_v29 }
  0x95   :  { %v3094_v41 = vld [vmem:[%s5563_s1 + $0x5c8] sm:$0xf]  ;;  %v3687_v43 = vld [vmem:[%s5563_s1 + $0x5d4] sm:$0xf0]  ;;  %v2967_v48 = vor.u32 %v3655_v39, %v2966_v36 }
  0x96   :  { %1794 = vmatpush.bf16.msra.mxu0 %v2407_v44  ;;  %1807 = vmatpush.bf16.msra.mxu1 %v2535_v45  ;;  %v3222_v44 = vld [vmem:[%s5563_s1 + $0x6c8] sm:$0xf]  ;;  %v3719_v45 = vld [vmem:[%s5563_s1 + $0x6d4] sm:$0xf0]  ;;  %v3095_v49 = vor.u32 %v3687_v43, %v3094_v41 }
  0x97   :  { %1820 = vmatpush.bf16.msra.mxu2 %v2663_v46  ;;  %v3350_v46 = vld [vmem:[%s5563_s1 + $0x7c8] sm:$0xf]  ;;  %v3751_v47 = vld [vmem:[%s5563_s1 + $0x7d4] sm:$0xf0] }
  0x98   :  { %1833 = vmatpush.bf16.msra.mxu3 %v2791_v50  ;;  %v3223_v50 = vor.u32 %v3719_v45, %v3222_v44  ;;  %v2950_v51 = vld [vmem:[%s5563_s1 + $0x4a8] sm:$0xf]  ;;  %v3651_v52 = vld [vmem:[%s5563_s1 + $0x4b4] sm:$0xf0]  ;;  %v3351_v54 = vor.u32 %v3751_v47, %v3350_v46 }
  0x99   :  { %v3078_v53 = vld [vmem:[%s5563_s1 + $0x5a8] sm:$0xf]  ;;  %v3683_v55 = vld [vmem:[%s5563_s1 + $0x5b4] sm:$0xf0]  ;;  %v2951_v60 = vor.u32 %v3651_v52, %v2950_v51 }
  0x9a   :  { %1795 = vmatpush.bf16.msra.mxu0 %v2391_v56  ;;  %1808 = vmatpush.bf16.msra.mxu1 %v2519_v57  ;;  %v3206_v56 = vld [vmem:[%s5563_s1 + $0x6a8] sm:$0xf]  ;;  %v3715_v57 = vld [vmem:[%s5563_s1 + $0x6b4] sm:$0xf0] }
  0x9b   :  { %1821 = vmatpush.bf16.msra.mxu2 %v2647_v58  ;;  %v3334_v58 = vld [vmem:[%s5563_s1 + $0x7a8] sm:$0xf]  ;;  %v3747_v59 = vld [vmem:[%s5563_s1 + $0x7b4] sm:$0xf0]  ;;  %v3207_v63 = vor.u32 %v3715_v57, %v3206_v56 }
  0x9c   :  { %1834 = vmatpush.bf16.msra.mxu3 %v2775_v62  ;;  %v2934_v61 = vld [vmem:[%s5563_s1 + $0x488] sm:$0xf]  ;;  %v3079_v62 = vor.u32 %v3683_v55, %v3078_v53  ;;  %v3647_v0 = vld [vmem:[%s5563_s1 + $0x494] sm:$0xf0]  ;;  %v3335_v3 = vor.u32 %v3747_v59, %v3334_v58 }
  0x9d   :  { %v3062_v1 = vld [vmem:[%s5563_s1 + $0x588] sm:$0xf]  ;;  %v3679_v2 = vld [vmem:[%s5563_s1 + $0x594] sm:$0xf0]  ;;  %v2935_v11 = vor.u32 %v3647_v0, %v2934_v61 }
  0x9e   :  { %1796 = vmatpush.bf16.msra.mxu0 %v2375_v4  ;;  %1809 = vmatpush.bf16.msra.mxu1 %v2503_v7  ;;  %v3190_v4 = vld [vmem:[%s5563_s1 + $0x688] sm:$0xf]  ;;  %v3711_v5 = vld [vmem:[%s5563_s1 + $0x694] sm:$0xf0]  ;;  %v3063_v13 = vor.u32 %v3679_v2, %v3062_v1 }
  0x9f   :  { %1822 = vmatpush.bf16.msra.mxu2 %v2631_v10  ;;  %v3318_v7 = vld [vmem:[%s5563_s1 + $0x788] sm:$0xf]  ;;  %v3743_v10 = vld [vmem:[%s5563_s1 + $0x794] sm:$0xf0] }
  0xa0   :  { %1835 = vmatpush.bf16.msra.mxu3 %v2759_v14  ;;  %v2918_v12 = vld [vmem:[%s5563_s1 + $0x468] sm:$0xf]  ;;  %v3191_v14 = vor.u32 %v3711_v5, %v3190_v4  ;;  %v3643_v16 = vld [vmem:[%s5563_s1 + $0x474] sm:$0xf0]  ;;  %v3319_v19 = vor.u32 %v3743_v10, %v3318_v7 }
  0xa1   :  { %v3046_v17 = vld [vmem:[%s5563_s1 + $0x568] sm:$0xf]  ;;  %v3675_v20 = vld [vmem:[%s5563_s1 + $0x574] sm:$0xf0]  ;;  %v2919_v26 = vor.u32 %v3643_v16, %v2918_v12  ;;  %v1604_v45 = vpop.f32.mrf.mxu1  ;;  %v2472_v16 = vld [vmem:[%s5563_s1 + $0xf8] sm:$0xf0] }
  0xa2   :  { %1797 = vmatpush.bf16.msra.mxu0 %v2359_v22  ;;  %1810 = vmatpush.bf16.msra.mxu1 %v2487_v27  ;;  %v3174_v21 = vld [vmem:[%s5563_s1 + $0x668] sm:$0xf]  ;;  %v3707_v22 = vld [vmem:[%s5563_s1 + $0x674] sm:$0xf0] }
  0xa3   :  { %1823 = vmatpush.bf16.msra.mxu2 %v2615_v28  ;;  %v3302_v23 = vld [vmem:[%s5563_s1 + $0x768] sm:$0xf]  ;;  %v3739_v24 = vld [vmem:[%s5563_s1 + $0x774] sm:$0xf0]  ;;  %v3047_v28 = vor.u32 %v3675_v20, %v3046_v17  ;;  %v3175_v29 = vor.u32 %v3707_v22, %v3174_v21  ;;  %v3561_v17 = vld [vmem:[%s5563_s1 + $0x1ec] sm:$0xf] }
  0xa4   :  { %1836 = vmatpush.bf16.msra.mxu3 %v2743_v31  ;;  %v2902_v30 = vld [vmem:[%s5563_s1 + $0x448] sm:$0xf]  ;;  %v3639_v31 = vld [vmem:[%s5563_s1 + $0x454] sm:$0xf0]  ;;  %v3593_v20 = vld [vmem:[%s5563_s1 + $0x2ec] sm:$0xf] }
  0xa5   :  { %1798 = vmatmul.bf16.vlgmr.msra.gmra.mxu0 %v4104_v9  ;;  %1811 = vmatmul.bf16.vlgmr.msra.gmra.mxu1 %v4141_v25  ;;  %v3671_v36 = vld [vmem:[%s5563_s1 + $0x554] sm:$0xf0]  ;;  %v3158_v39 = vld [vmem:[%s5563_s1 + $0x648] sm:$0xf]  ;;  %v2903_v44 = vor.u32 %v3639_v31, %v2902_v30  ;;  %v2728_v21 = vld [vmem:[%s5563_s1 + $0x2f8] sm:$0xf0] }
  0xa6   :  { %1842 = vmatpush.bf16.msrb.mxu0 %v2983_v32  ;;  %1855 = vmatpush.bf16.msrb.mxu1 %v3111_v33  ;;  %v3030_v32 = vld [vmem:[%s5563_s1 + $0x548] sm:$0xf]  ;;  %v3703_v41 = vld [vmem:[%s5563_s1 + $0x654] sm:$0xf0] }
  0xa7   :  { %1868 = vmatpush.bf16.msrb.mxu2 %v3239_v35  ;;  %1837 = vmatmul.bf16.vlgmr.msra.gmra.mxu3 %v4118_v15  ;;  %v3303_v35 = vor.u32 %v3739_v24, %v3302_v23  ;;  %v3735_v43 = vld [vmem:[%s5563_s1 + $0x754] sm:$0xf0]  ;;  %v3031_v46 = vor.u32 %v3671_v36, %v3030_v32  ;;  %v3159_v47 = vor.u32 %v3703_v41, %v3158_v39  ;;  %v3270_v57 = vld [vmem:[%s5563_s1 + $0x728] sm:$0xf]  ;;  %v3557_v36 = vld [vmem:[%s5563_s1 + $0x1cc] sm:$0xf] }
  0xa8   :  { %1881 = vmatpush.bf16.msrb.mxu3 %v3367_v42  ;;  %1824 = vmatmul.bf16.vlgmr.msra.gmra.mxu2 %v4102_v8  ;;  %v3286_v42 = vld [vmem:[%s5563_s1 + $0x748] sm:$0xf]  ;;  %v3667_v53 = vld [vmem:[%s5563_s1 + $0x534] sm:$0xf0]  ;;  %v2731_v32 = vor.u32 %v3593_v20, %v2728_v21 }
  0xa9   :  { %v3287_v52 = vor.u32 %v3735_v43, %v3286_v42  ;;  %v3699_v55 = vld [vmem:[%s5563_s1 + $0x634] sm:$0xf0]  ;;  %v3126_v5 = vld [vmem:[%s5563_s1 + $0x608] sm:$0xf]  ;;  %v1606_v22 = vpop.f32.mrf.mxu1  ;;  %v2584_v42 = vld [vmem:[%s5563_s1 + $0x1d8] sm:$0xf0] }
  0xaa   :  { %1843 = vmatpush.bf16.msrb.mxu0 %v2967_v48  ;;  %1856 = vmatpush.bf16.msrb.mxu1 %v3095_v49  ;;  %v2886_v48 = vld [vmem:[%s5563_s1 + $0x428] sm:$0xf]  ;;  %v3635_v49 = vld [vmem:[%s5563_s1 + $0x434] sm:$0xf0]  ;;  %v3589_v43 = vld [vmem:[%s5563_s1 + $0x2cc] sm:$0xf] }
  0xab   :  { %1869 = vmatpush.bf16.msrb.mxu2 %v3223_v50  ;;  %v3014_v50 = vld [vmem:[%s5563_s1 + $0x528] sm:$0xf]  ;;  %v3731_v58 = vld [vmem:[%s5563_s1 + $0x734] sm:$0xf0]  ;;  %v2887_v61 = vor.u32 %v3635_v49, %v2886_v48  ;;  %v2587_v48 = vor.u32 %v3557_v36, %v2584_v42  ;;  %v2536_v22 = vld [vmem:[%s5563_s1 + $0x178] sm:$0xf0] }
  0xac   :  { %1882 = vmatpush.bf16.msrb.mxu3 %v3351_v54  ;;  %v3142_v54 = vld [vmem:[%s5563_s1 + $0x628] sm:$0xf]  ;;  %v3015_v1 = vor.u32 %v3667_v53, %v3014_v50  ;;  %v3663_v4 = vld [vmem:[%s5563_s1 + $0x514] sm:$0xf0]  ;;  %v3271_v10 = vor.u32 %v3731_v58, %v3270_v57  ;;  %v3521_v50 = vld [vmem:[%s5563_s1 + $0xac] sm:$0xf] }
  0xad   :  { %v3143_v2 = vor.u32 %v3699_v55, %v3142_v54  ;;  %v3254_v12 = vld [vmem:[%s5563_s1 + $0x708] sm:$0xf]  ;;  %v2568_v54 = vld [vmem:[%s5563_s1 + $0x1b8] sm:$0xf0]  ;;  %v3585_v55 = vld [vmem:[%s5563_s1 + $0x2ac] sm:$0xf] }
  0xae   :  { %1844 = vmatpush.bf16.msrb.mxu0 %v2951_v60  ;;  %1857 = vmatpush.bf16.msrb.mxu1 %v3079_v62  ;;  %v1591_v27 = vpop.f32.mrf.mxu0  ;;  %v1630_v60 = vpop.f32.mrf.mxu3  ;;  %v2870_v62 = vld [vmem:[%s5563_s1 + $0x408] sm:$0xf]  ;;  %v3617_v57 = vld [vmem:[%s5563_s1 + $0x3ac] sm:$0xf]  ;;  %v2824_v58 = vld [vmem:[%s5563_s1 + $0x3b8] sm:$0xf0] }
  0xaf   :  { %1870 = vmatpush.bf16.msrb.mxu2 %v3207_v63  ;;  %v1592_v33 = vadd.f32 %v1591_v27, %v294_v18  ;;  %v3631_v63 = vld [vmem:[%s5563_s1 + $0x414] sm:$0xf0]  ;;  %v2856_v27 = vld [vmem:[%s5563_s1 + $0x3f8] sm:$0xf0] }
  0xb0   :  { %1883 = vmatpush.bf16.msrb.mxu3 %v3335_v3  ;;  %v2998_v3 = vld [vmem:[%s5563_s1 + $0x508] sm:$0xf]  ;;  %v2871_v18 = vor.u32 %v3631_v63, %v2870_v62  ;;  %v3517_v62 = vld [vmem:[%s5563_s1 + $0x8c] sm:$0xf]  ;;  %v2424_v63 = vld [vmem:[%s5563_s1 + $0x98] sm:$0xf0] }
  0xb1   :  { %v1605_v51 = vadd.f32 %v1604_v45, %v1592_v33  ;;  %v2999_v23 = vor.u32 %v3663_v4, %v2998_v3  ;;  %v3525_v33 = vld [vmem:[%s5563_s1 + $0xcc] sm:$0xf]  ;;  %v2680_v4 = vld [vmem:[%s5563_s1 + $0x298] sm:$0xf0] }
  0xb2   :  { %1845 = vmatpush.bf16.msrb.mxu0 %v2935_v11  ;;  %1858 = vmatpush.bf16.msrb.mxu1 %v3063_v13  ;;  %v3695_v11 = vld [vmem:[%s5563_s1 + $0x614] sm:$0xf0]  ;;  %v3621_v45 = vld [vmem:[%s5563_s1 + $0x3cc] sm:$0xf]  ;;  %v2648_v42 = vld [vmem:[%s5563_s1 + $0x258] sm:$0xf0] }
  0xb3   :  { %1871 = vmatpush.bf16.msrb.mxu2 %v3191_v14  ;;  %v1617_v56 = vpop.f32.mrf.mxu2  ;;  %v3727_v13 = vld [vmem:[%s5563_s1 + $0x714] sm:$0xf0]  ;;  %v3529_v14 = vld [vmem:[%s5563_s1 + $0xec] sm:$0xf]  ;;  %v3127_v24 = vor.u32 %v3695_v11, %v3126_v5  ;;  %v2427_v11 = vor.u32 %v3517_v62, %v2424_v63 }
  0xb4   :  { %1884 = vmatpush.bf16.msrb.mxu3 %v3319_v19  ;;  %v1618_v59 = vadd.f32 %v1617_v56, %v1605_v51  ;;  %v2600_v19 = vld [vmem:[%s5563_s1 + $0x1f8] sm:$0xf0]  ;;  %v3581_v3 = vld [vmem:[%s5563_s1 + $0x28c] sm:$0xf] }
  0xb5   :  { %v2603_v31 = vor.u32 %v3561_v17, %v2600_v19  ;;  %v2440_v51 = vld [vmem:[%s5563_s1 + $0xb8] sm:$0xf0]  ;;  %v3613_v5 = vld [vmem:[%s5563_s1 + $0x38c] sm:$0xf] }
  0xb6   :  { %1846 = vmatpush.bf16.msrb.mxu0 %v2919_v26  ;;  %1859 = vmatpush.bf16.msrb.mxu1 %v3047_v28  ;;  %v1593_v0 = vpop.f32.mrf.mxu0  ;;  %v5032_v7 = vadd.f32 %v1630_v60, %v1618_v59  ;;  %v3625_v26 = vld [vmem:[%s5563_s1 + $0x3ec] sm:$0xf]  ;;  %v3255_v28 = vor.u32 %v3727_v13, %v3254_v12  ;;  %v1632_v39 = vpop.f32.mrf.mxu3  ;;  %v2696_v56 = vld [vmem:[%s5563_s1 + $0x2b8] sm:$0xf0]  ;;  %v2443_v59 = vor.u32 %v3521_v50, %v2440_v51 }
  0xb7   :  { %1872 = vmatpush.bf16.msrb.mxu2 %v3175_v29  ;;  %v2475_v29 = vor.u32 %v3529_v14, %v2472_v16  ;;  %v2859_v41 = vor.u32 %v3625_v26, %v2856_v27  ;;  %v3549_v0 = vld [vmem:[%s5563_s1 + $0x18c] sm:$0xf]  ;;  %v2683_v14 = vor.u32 %v3581_v3, %v2680_v4  ;;  %v2408_v17 = vld [vmem:[%s5563_s1 + $0x78] sm:$0xf0] }
  0xb8   :  { %1885 = vmatpush.bf16.msrb.mxu3 %v3303_v35  ;;  %v2456_v35 = vld [vmem:[%s5563_s1 + $0xd8] sm:$0xf0]  ;;  %v3513_v16 = vld [vmem:[%s5563_s1 + $0x6c] sm:$0xf] }
  0xb9   :  { %v3609_v26 = vld [vmem:[%s5563_s1 + $0x36c] sm:$0xf]  ;;  %v2520_v39 = vld [vmem:[%s5563_s1 + $0x158] sm:$0xf0] }
  0xba   :  { %1847 = vmatpush.bf16.msrb.mxu0 %v2903_v44  ;;  %1860 = vmatpush.bf16.msrb.mxu1 %v3031_v46  ;;  %v2712_v44 = vld [vmem:[%s5563_s1 + $0x2d8] sm:$0xf0]  ;;  %v3501_v63 = vld [vmem:[%s5563_s1 + $0xc] sm:$0xf] }
  0xbb   :  { %1873 = vmatpush.bf16.msrb.mxu2 %v3159_v47  ;;  %v1619_v30 = vpop.f32.mrf.mxu2  ;;  %v2840_v46 = vld [vmem:[%s5563_s1 + $0x3d8] sm:$0xf0]  ;;  %v2459_v47 = vor.u32 %v3525_v33, %v2456_v35  ;;  %v2715_v49 = vor.u32 %v3589_v43, %v2712_v44  ;;  %v3541_v33 = vld [vmem:[%s5563_s1 + $0x14c] sm:$0xf] }
  0xbc   :  { %1886 = vmatpush.bf16.msrb.mxu3 %v3287_v52  ;;  %v3553_v52 = vld [vmem:[%s5563_s1 + $0x1ac] sm:$0xf]  ;;  %v2843_v53 = vor.u32 %v3621_v45, %v2840_v46  ;;  %v2776_v46 = vld [vmem:[%s5563_s1 + $0x358] sm:$0xf0]  ;;  %v2523_v50 = vor.u32 %v3541_v33, %v2520_v39 }
  0xbd   :  { %v2571_v60 = vor.u32 %v3553_v52, %v2568_v54  ;;  %v3605_v45 = vld [vmem:[%s5563_s1 + $0x34c] sm:$0xf]  ;;  %v2488_v4 = vld [vmem:[%s5563_s1 + $0x118] sm:$0xf0] }
  0xbe   :  { %1848 = vmatpush.bf16.msrb.mxu0 %v2887_v61  ;;  %1861 = vmatpush.bf16.msrb.mxu1 %v3015_v1  ;;  %v2699_v61 = vor.u32 %v3585_v55, %v2696_v56  ;;  %v2827_v1 = vor.u32 %v3617_v57, %v2824_v58  ;;  %v3505_v52 = vld [vmem:[%s5563_s1 + $0x2c] sm:$0xf]  ;;  %v2779_v56 = vor.u32 %v3605_v45, %v2776_v46  ;;  %v2504_v57 = vld [vmem:[%s5563_s1 + $0x138] sm:$0xf0] }
  0xbf   :  { %1874 = vmatpush.bf16.msrb.mxu2 %v3143_v2  ;;  %v2552_v2 = vld [vmem:[%s5563_s1 + $0x198] sm:$0xf0]  ;;  %v3537_v54 = vld [vmem:[%s5563_s1 + $0x12c] sm:$0xf] }
  0xc0   :  { %1887 = vmatpush.bf16.msrb.mxu3 %v3271_v10  ;;  %v2808_v10 = vld [vmem:[%s5563_s1 + $0x398] sm:$0xf0]  ;;  %v2555_v13 = vor.u32 %v3549_v0, %v2552_v2  ;;  %v3569_v58 = vld [vmem:[%s5563_s1 + $0x22c] sm:$0xf] }
  0xc1   :  { %v2811_v21 = vor.u32 %v3613_v5, %v2808_v10  ;;  %v2360_v0 = vld [vmem:[%s5563_s1 + $0x18] sm:$0xf0]  ;;  %v3533_v3 = vld [vmem:[%s5563_s1 + $0x10c] sm:$0xf] }
  0xc2   :  { %1849 = vmatpush.bf16.msrb.mxu0 %v2871_v18  ;;  %1862 = vmatpush.bf16.msrb.mxu1 %v2999_v23  ;;  %v1643_v12 = vpop.f32.mrf.mxu0  ;;  %v3545_v18 = vld [vmem:[%s5563_s1 + $0x16c] sm:$0xf]  ;;  %v1656_v20 = vpop.f32.mrf.mxu1  ;;  %v2968_v33 = vld [vmem:[%s5563_s1 + $0x4d8] sm:$0xf0] }
  0xc3   :  { %1875 = vmatpush.bf16.msrb.mxu2 %v3127_v24  ;;  %v1644_v19 = vadd.f32 %v1643_v12, %v5032_v7  ;;  %v3577_v23 = vld [vmem:[%s5563_s1 + $0x26c] sm:$0xf]  ;;  %v2664_v24 = vld [vmem:[%s5563_s1 + $0x278] sm:$0xf0] }
  0xc4   :  { %1888 = vmatpush.bf16.msrb.mxu3 %v3255_v28  ;;  %v2792_v7 = vld [vmem:[%s5563_s1 + $0x378] sm:$0xf0]  ;;  %v2411_v28 = vor.u32 %v3513_v16, %v2408_v17  ;;  %v2667_v30 = vor.u32 %v3577_v23, %v2664_v24  ;;  %v3565_v5 = vld [vmem:[%s5563_s1 + $0x20c] sm:$0xf]  ;;  %v2491_v24 = vor.u32 %v3533_v3, %v2488_v4 }
  0xc5   :  { %1850 = vmatmul.bf16.vlgmr.msrb.gmra.mxu0 %v4293_v37  ;;  %1863 = vmatmul.bf16.vlgmr.msrb.gmra.mxu1 %v4297_v40  ;;  %v1657_v27 = vadd.f32 %v1656_v20, %v1644_v19  ;;  %v2795_v36 = vor.u32 %v3609_v26, %v2792_v7  ;;  %v2616_v12 = vld [vmem:[%s5563_s1 + $0x218] sm:$0xf0]  ;;  %v3657_v17 = vld [vmem:[%s5563_s1 + $0x4ec] sm:$0xf]  ;;  %v2363_v20 = vor.u32 %v3501_v63, %v2360_v0 }
  0xc6   :  { %1894 = vmatpush.bf16.msra.mxu0 %v2475_v29  ;;  %1907 = vmatpush.bf16.msra.mxu1 %v2603_v31  ;;  %v2539_v29 = vor.u32 %v3545_v18, %v2536_v22  ;;  %v3509_v31 = vld [vmem:[%s5563_s1 + $0x4c] sm:$0xf]  ;;  %v2984_v18 = vld [vmem:[%s5563_s1 + $0x4f8] sm:$0xf0]  ;;  %v2619_v26 = vor.u32 %v3565_v5, %v2616_v12 }
  0xc7   :  { %1920 = vmatpush.bf16.msra.mxu2 %v2731_v32  ;;  %1889 = vmatmul.bf16.vlgmr.msrb.gmra.mxu3 %v4295_v38  ;;  %v2392_v32 = vld [vmem:[%s5563_s1 + $0x58] sm:$0xf0]  ;;  %v3689_v19 = vld [vmem:[%s5563_s1 + $0x5ec] sm:$0xf] }
  0xc8   :  { %1933 = vmatpush.bf16.msra.mxu3 %v2859_v41  ;;  %1876 = vmatmul.bf16.vlgmr.msrb.gmra.mxu2 %v4285_v34  ;;  %v3573_v41 = vld [vmem:[%s5563_s1 + $0x24c] sm:$0xf]  ;;  %v3240_v23 = vld [vmem:[%s5563_s1 + $0x6f8] sm:$0xf0] }
  0xc9   :  { %v2651_v51 = vor.u32 %v3573_v41, %v2648_v42  ;;  %v3721_v22 = vld [vmem:[%s5563_s1 + $0x6ec] sm:$0xf]  ;;  %v3096_v39 = vld [vmem:[%s5563_s1 + $0x5d8] sm:$0xf0] }
  0xca   :  { %1895 = vmatpush.bf16.msra.mxu0 %v2459_v47  ;;  %1908 = vmatpush.bf16.msra.mxu1 %v2587_v48  ;;  %v1682_v44 = vpop.f32.mrf.mxu3  ;;  %v2395_v47 = vor.u32 %v3509_v31, %v2392_v32  ;;  %v1658_v55 = vpop.f32.mrf.mxu1  ;;  %v3753_v7 = vld [vmem:[%s5563_s1 + $0x7ec] sm:$0xf]  ;;  %v3243_v31 = vor.u32 %v3721_v22, %v3240_v23  ;;  %v3224_v42 = vld [vmem:[%s5563_s1 + $0x6d8] sm:$0xf0] }
  0xcb   :  { %1921 = vmatpush.bf16.msra.mxu2 %v2715_v49  ;;  %v1669_v35 = vpop.f32.mrf.mxu2  ;;  %v1645_v49 = vpop.f32.mrf.mxu0  ;;  %v3653_v32 = vld [vmem:[%s5563_s1 + $0x4cc] sm:$0xf]  ;;  %v3208_v55 = vld [vmem:[%s5563_s1 + $0x6b8] sm:$0xf0] }
  0xcc   :  { %1934 = vmatpush.bf16.msra.mxu3 %v2843_v53  ;;  %v1670_v43 = vadd.f32 %v1669_v35, %v1657_v27  ;;  %v2376_v53 = vld [vmem:[%s5563_s1 + $0x38] sm:$0xf0]  ;;  %v3685_v35 = vld [vmem:[%s5563_s1 + $0x5cc] sm:$0xf]  ;;  %v2971_v45 = vor.u32 %v3653_v32, %v2968_v33 }
  0xcd   :  { %v2379_v62 = vor.u32 %v3505_v52, %v2376_v53  ;;  %v3368_v27 = vld [vmem:[%s5563_s1 + $0x7f8] sm:$0xf0]  ;;  %v3717_v41 = vld [vmem:[%s5563_s1 + $0x6cc] sm:$0xf]  ;;  %v3099_v46 = vor.u32 %v3685_v35, %v3096_v39 }
  0xce   :  { %1896 = vmatpush.bf16.msra.mxu0 %v2443_v59  ;;  %1909 = vmatpush.bf16.msra.mxu1 %v2571_v60  ;;  %v5192_v48 = vadd.f32 %v1682_v44, %v1670_v43  ;;  %v2632_v59 = vld [vmem:[%s5563_s1 + $0x238] sm:$0xf0]  ;;  %v3601_v60 = vld [vmem:[%s5563_s1 + $0x32c] sm:$0xf] }
  0xcf   :  { %1922 = vmatpush.bf16.msra.mxu2 %v2699_v61  ;;  %v2760_v61 = vld [vmem:[%s5563_s1 + $0x338] sm:$0xf0]  ;;  %v2635_v2 = vor.u32 %v3569_v58, %v2632_v59  ;;  %v3749_v43 = vld [vmem:[%s5563_s1 + $0x7cc] sm:$0xf] }
  0xd0   :  { %1935 = vmatpush.bf16.msra.mxu3 %v2827_v1  ;;  %v2507_v1 = vor.u32 %v3537_v54, %v2504_v57  ;;  %v3352_v44 = vld [vmem:[%s5563_s1 + $0x7d8] sm:$0xf0]  ;;  %v3649_v49 = vld [vmem:[%s5563_s1 + $0x4ac] sm:$0xf] }
  0xd1   :  { %v3355_v52 = vor.u32 %v3749_v43, %v3352_v44  ;;  %v3080_v53 = vld [vmem:[%s5563_s1 + $0x5b8] sm:$0xf0]  ;;  %v3713_v54 = vld [vmem:[%s5563_s1 + $0x6ac] sm:$0xf] }
  0xd2   :  { %1897 = vmatpush.bf16.msra.mxu0 %v2427_v11  ;;  %1910 = vmatpush.bf16.msra.mxu1 %v2555_v13  ;;  %v2763_v11 = vor.u32 %v3601_v60, %v2760_v61  ;;  %v3597_v13 = vld [vmem:[%s5563_s1 + $0x30c] sm:$0xf]  ;;  %v1684_v16 = vpop.f32.mrf.mxu3  ;;  %v3211_v59 = vor.u32 %v3713_v54, %v3208_v55  ;;  %v2936_v61 = vld [vmem:[%s5563_s1 + $0x498] sm:$0xf0]  ;;  %v295_v54 = vperm.slane %v4936_v6, 1 }
  0xd3   :  { %1923 = vmatpush.bf16.msra.mxu2 %v2683_v14  ;;  %v1671_v10 = vpop.f32.mrf.mxu2  ;;  %v2744_v14 = vld [vmem:[%s5563_s1 + $0x318] sm:$0xf0]  ;;  %v3645_v60 = vld [vmem:[%s5563_s1 + $0x48c] sm:$0xf] }
  0xd4   :  { %1936 = vmatpush.bf16.msra.mxu3 %v2811_v21  ;;  %v3112_v21 = vld [vmem:[%s5563_s1 + $0x5f8] sm:$0xf0]  ;;  %v3741_v0 = vld [vmem:[%s5563_s1 + $0x78c] sm:$0xf] }
  0xd5   :  { %v3192_v63 = vld [vmem:[%s5563_s1 + $0x698] sm:$0xf0]  ;;  %v3641_v10 = vld [vmem:[%s5563_s1 + $0x46c] sm:$0xf] }
  0xd6   :  { %1898 = vmatpush.bf16.msra.mxu0 %v2411_v28  ;;  %1911 = vmatpush.bf16.msra.mxu1 %v2539_v29  ;;  %v2747_v28 = vor.u32 %v3597_v13, %v2744_v14  ;;  %v2987_v29 = vor.u32 %v3657_v17, %v2984_v18  ;;  %v3673_v12 = vld [vmem:[%s5563_s1 + $0x56c] sm:$0xf]  ;;  %v3048_v16 = vld [vmem:[%s5563_s1 + $0x578] sm:$0xf0] }
  0xd7   :  { %1924 = vmatpush.bf16.msra.mxu2 %v2667_v30  ;;  %v3115_v30 = vor.u32 %v3689_v19, %v3112_v21  ;;  %v3705_v17 = vld [vmem:[%s5563_s1 + $0x66c] sm:$0xf]  ;;  %v3176_v18 = vld [vmem:[%s5563_s1 + $0x678] sm:$0xf0]  ;;  %v3051_v22 = vor.u32 %v3673_v12, %v3048_v16 }
  0xd8   :  { %1937 = vmatpush.bf16.msra.mxu3 %v2795_v36  ;;  %v3371_v36 = vor.u32 %v3753_v7, %v3368_v27  ;;  %v3737_v19 = vld [vmem:[%s5563_s1 + $0x76c] sm:$0xf]  ;;  %v3179_v23 = vor.u32 %v3705_v17, %v3176_v18  ;;  %v3288_v35 = vld [vmem:[%s5563_s1 + $0x758] sm:$0xf0] }
  0xd9   :  { %v3669_v7 = vld [vmem:[%s5563_s1 + $0x54c] sm:$0xf]  ;;  %v2888_v44 = vld [vmem:[%s5563_s1 + $0x438] sm:$0xf0] }
  0xda   :  { %1899 = vmatpush.bf16.msra.mxu0 %v2395_v47  ;;  %1912 = vmatpush.bf16.msra.mxu1 %v2523_v50  ;;  %v3227_v47 = vor.u32 %v3717_v41, %v3224_v42  ;;  %v2952_v50 = vld [vmem:[%s5563_s1 + $0x4b8] sm:$0xf0]  ;;  %v3733_v33 = vld [vmem:[%s5563_s1 + $0x74c] sm:$0xf] }
  0xdb   :  { %1925 = vmatpush.bf16.msra.mxu2 %v2651_v51  ;;  %v3681_v51 = vld [vmem:[%s5563_s1 + $0x5ac] sm:$0xf]  ;;  %v2955_v57 = vor.u32 %v3649_v49, %v2952_v50  ;;  %v3016_v49 = vld [vmem:[%s5563_s1 + $0x538] sm:$0xf0] }
  0xdc   :  { %1938 = vmatpush.bf16.msra.mxu3 %v2779_v56  ;;  %v3745_v56 = vld [vmem:[%s5563_s1 + $0x7ac] sm:$0xf]  ;;  %v3083_v58 = vor.u32 %v3681_v51, %v3080_v53  ;;  %v3144_v51 = vld [vmem:[%s5563_s1 + $0x638] sm:$0xf0] }
  0xdd   :  { %v3633_v43 = vld [vmem:[%s5563_s1 + $0x42c] sm:$0xf]  ;;  %v3272_v53 = vld [vmem:[%s5563_s1 + $0x738] sm:$0xf0] }
  0xde   :  { %1900 = vmatpush.bf16.msra.mxu0 %v2379_v62  ;;  %1913 = vmatpush.bf16.msra.mxu1 %v2507_v1  ;;  %v3709_v62 = vld [vmem:[%s5563_s1 + $0x68c] sm:$0xf]  ;;  %v3320_v1 = vld [vmem:[%s5563_s1 + $0x798] sm:$0xf0]  ;;  %v2891_v55 = vor.u32 %v3633_v43, %v2888_v44 }
  0xdf   :  { %1926 = vmatpush.bf16.msra.mxu2 %v2635_v2  ;;  %v2939_v2 = vor.u32 %v3645_v60, %v2936_v61  ;;  %v3195_v5 = vor.u32 %v3709_v62, %v3192_v63  ;;  %v3323_v14 = vor.u32 %v3741_v0, %v3320_v1  ;;  %v3697_v50 = vld [vmem:[%s5563_s1 + $0x62c] sm:$0xf]  ;;  %v3256_v0 = vld [vmem:[%s5563_s1 + $0x718] sm:$0xf0] }
  0xe0   :  { %1939 = vmatpush.bf16.msra.mxu3 %v2763_v11  ;;  %v2920_v11 = vld [vmem:[%s5563_s1 + $0x478] sm:$0xf0]  ;;  %v3725_v63 = vld [vmem:[%s5563_s1 + $0x70c] sm:$0xf] }
  0xe1   :  { %v2923_v21 = vor.u32 %v3641_v10, %v2920_v11  ;;  %v3259_v10 = vor.u32 %v3725_v63, %v3256_v0  ;;  %v3763_v11 = vld [vmem:[%s5566_s3 + $0x38] sm:$0xff]  ;;  %v3761_v18 = vld [vmem:[%s5566_s3 + $0x28] sm:$0xff] }
  0xe2   :  { %1901 = vmatpush.bf16.msra.mxu0 %v2363_v20  ;;  %1914 = vmatpush.bf16.msra.mxu1 %v2491_v24  ;;  %v5342_v3 = vpop.f32.mrf.mxu0  ;;  %v5353_v13 = vpop.f32.mrf.mxu1  ;;  %v3304_v20 = vld [vmem:[%s5563_s1 + $0x778] sm:$0xf0]  ;;  %v3637_v24 = vld [vmem:[%s5563_s1 + $0x44c] sm:$0xf] }
  0xe3   :  { %1927 = vmatpush.bf16.msra.mxu2 %v2619_v26  ;;  %v2904_v26 = vld [vmem:[%s5563_s1 + $0x458] sm:$0xf0]  ;;  %v1696_v1 = vadd.f32 %v5342_v3, %v295_v54  ;;  %v3762_v3 = vld [vmem:[%s5566_s3 + $0x30] sm:$0xff] }
  0xe4   :  { %1940 = vmatpush.bf16.msra.mxu3 %v2747_v28  ;;  %v3307_v28 = vor.u32 %v3737_v19, %v3304_v20  ;;  %v3771_v12 = vld [vmem:[%s5566_s3 + $0x78] sm:$0xff]  ;;  %v3769_v19 = vld [vmem:[%s5566_s3 + $0x68] sm:$0xff]  ;;  %v3774_v54 = vld [vmem:[%s5566_s3 + $0x90] sm:$0xff] }
  0xe5   :  { %1902 = vmatmul.bf16.vlgmr.msra.gmra.mxu0 %v4104_v9  ;;  %1915 = vmatmul.bf16.vlgmr.msra.gmra.mxu1 %v4141_v25  ;;  %v3677_v9 = vld [vmem:[%s5563_s1 + $0x58c] sm:$0xf]  ;;  %v3064_v25 = vld [vmem:[%s5563_s1 + $0x598] sm:$0xf0] }
  0xe6   :  { %1946 = vmatpush.bf16.msrb.mxu0 %v2987_v29  ;;  %1959 = vmatpush.bf16.msrb.mxu1 %v3115_v30  ;;  %v3067_v4 = vor.u32 %v3677_v9, %v3064_v25  ;;  %v3032_v29 = vld [vmem:[%s5563_s1 + $0x558] sm:$0xf0]  ;;  %v3701_v30 = vld [vmem:[%s5563_s1 + $0x64c] sm:$0xf] }
  0xe7   :  { %1972 = vmatpush.bf16.msrb.mxu2 %v3243_v31  ;;  %1941 = vmatmul.bf16.vlgmr.msra.gmra.mxu3 %v4118_v15  ;;  %v3160_v31 = vld [vmem:[%s5563_s1 + $0x658] sm:$0xf0]  ;;  %v3035_v41 = vor.u32 %v3669_v7, %v3032_v29  ;;  %v3758_v29 = vld [vmem:[%s5566_s3 + $0x10] sm:$0xff] }
  0xe8   :  { %1985 = vmatpush.bf16.msrb.mxu3 %v3371_v36  ;;  %1928 = vmatmul.bf16.vlgmr.msra.gmra.mxu2 %v4102_v8  ;;  %v3336_v8 = vld [vmem:[%s5563_s1 + $0x7b8] sm:$0xf0]  ;;  %v2907_v36 = vor.u32 %v3637_v24, %v2904_v26  ;;  %v3163_v42 = vor.u32 %v3701_v30, %v3160_v31 }
  0xe9   :  { %v3339_v15 = vor.u32 %v3745_v56, %v3336_v8  ;;  %v3147_v8 = vor.u32 %v3697_v50, %v3144_v51  ;;  %v3000_v9 = vld [vmem:[%s5563_s1 + $0x518] sm:$0xf0] }
  0xea   :  { %1947 = vmatpush.bf16.msrb.mxu0 %v2971_v45  ;;  %1960 = vmatpush.bf16.msrb.mxu1 %v3099_v46  ;;  %v5390_v32 = vpop.f32.mrf.mxu3  ;;  %v1697_v39 = vpop.f32.mrf.mxu0  ;;  %v3665_v45 = vld [vmem:[%s5563_s1 + $0x52c] sm:$0xf]  ;;  %v3128_v25 = vld [vmem:[%s5563_s1 + $0x618] sm:$0xf0] }
  0xeb   :  { %1973 = vmatpush.bf16.msrb.mxu2 %v3227_v47  ;;  %v5379_v27 = vpop.f32.mrf.mxu2  ;;  %v1710_v46 = vpop.f32.mrf.mxu1  ;;  %v3291_v47 = vor.u32 %v3733_v33, %v3288_v35  ;;  %v3019_v56 = vor.u32 %v3665_v45, %v3016_v49  ;;  %v3779_v16 = vld [vmem:[%s5566_s3 + $0xb8] sm:$0xff]  ;;  %v3766_v33 = vld [vmem:[%s5566_s3 + $0x50] sm:$0xff]  ;;  %v3757_v39 = vld [vmem:[%s5566_s3 + $0x8] sm:$0xff] }
  0xec   :  { %1986 = vmatpush.bf16.msrb.mxu3 %v3355_v52  ;;  %v3729_v52 = vld [vmem:[%s5563_s1 + $0x72c] sm:$0xf]  ;;  %v3767_v26 = vld [vmem:[%s5566_s3 + $0x58] sm:$0xff]  ;;  %v3756_v46 = vld [vmem:[%s5566_s3] sm:$0xff] }
  0xed   :  { %v3275_v61 = vor.u32 %v3729_v52, %v3272_v53  ;;  %v3764_v49 = vld [vmem:[%s5566_s3 + $0x40] sm:$0xff] }
  0xee   :  { %1948 = vmatpush.bf16.msrb.mxu0 %v2955_v57  ;;  %1961 = vmatpush.bf16.msrb.mxu1 %v3083_v58  ;;  %v3629_v57 = vld [vmem:[%s5563_s1 + $0x40c] sm:$0xf]  ;;  %v2872_v58 = vld [vmem:[%s5563_s1 + $0x418] sm:$0xf0] }
  0xef   :  { %1974 = vmatpush.bf16.msrb.mxu2 %v3211_v59  ;;  %v3661_v59 = vld [vmem:[%s5563_s1 + $0x50c] sm:$0xf] }
  0xf0   :  { %1987 = vmatpush.bf16.msrb.mxu3 %v3339_v15  ;;  %v3693_v15 = vld [vmem:[%s5563_s1 + $0x60c] sm:$0xf] }
  0xf2   :  { %1949 = vmatpush.bf16.msrb.mxu0 %v2939_v2  ;;  %1962 = vmatpush.bf16.msrb.mxu1 %v3067_v4  ;;  %v1736_v62 = vpop.f32.mrf.mxu3  ;;  %v2875_v2 = vor.u32 %v3629_v57, %v2872_v58  ;;  %v3003_v4 = vor.u32 %v3661_v59, %v3000_v9  ;;  %v3772_v58 = vld [vmem:[%s5566_s3 + $0x80] sm:$0xff]  ;;  %v296_v59 = vperm.slane %v4936_v6, 2 }
  0xf3   :  { %1975 = vmatpush.bf16.msrb.mxu2 %v3195_v5  ;;  %v1723_v60 = vpop.f32.mrf.mxu2  ;;  %v3131_v5 = vor.u32 %v3693_v15, %v3128_v25 }
  0xf4   :  { %1988 = vmatpush.bf16.msrb.mxu3 %v3323_v14  ;;  %v1709_v14 = vadd.f32 %v5353_v13, %v1696_v1  ;;  %v3770_v13 = vld [vmem:[%s5566_s3 + $0x70] sm:$0xff] }
  0xf6   :  { %1950 = vmatpush.bf16.msrb.mxu0 %v2923_v21  ;;  %1963 = vmatpush.bf16.msrb.mxu1 %v3051_v22  ;;  %v1722_v17 = vadd.f32 %v5379_v27, %v1709_v14  ;;  %v3778_v22 = vld [vmem:[%s5566_s3 + $0xb0] sm:$0xff] }
  0xf7   :  { %1976 = vmatpush.bf16.msrb.mxu2 %v3179_v23  ;;  %v3759_v23 = vld [vmem:[%s5566_s3 + $0x18] sm:$0xff] }
  0xf8   :  { %1989 = vmatpush.bf16.msrb.mxu3 %v3307_v28  ;;  %v3777_v28 = vld [vmem:[%s5566_s3 + $0xa8] sm:$0xff] }
  0xfa   :  { %1951 = vmatpush.bf16.msrb.mxu0 %v2907_v36  ;;  %1964 = vmatpush.bf16.msrb.mxu1 %v3035_v41  ;;  %v3775_v41 = vld [vmem:[%s5566_s3 + $0x98] sm:$0xff] }
  0xfb   :  { %1977 = vmatpush.bf16.msrb.mxu2 %v3163_v42  ;;  %v3765_v42 = vld [vmem:[%s5566_s3 + $0x48] sm:$0xff] }
  0xfc   :  { %1990 = vmatpush.bf16.msrb.mxu3 %v3291_v47  ;;  %v1998_v47 = vmax.f32 %v5192_v48, 0.0 }
  0xfe   :  { %1952 = vmatpush.bf16.msrb.mxu0 %v2891_v55  ;;  %1965 = vmatpush.bf16.msrb.mxu1 %v3019_v56  ;;  %v2002_v51 = vpack.c.bf16 %v1998_v47, %v1998_v47  ;;  %v3773_v56 = vld [vmem:[%s5566_s3 + $0x88] sm:$0xff] }
  0xff   :  { %1978 = vmatpush.bf16.msrb.mxu2 %v3147_v8 }
 0x100   :  { %1991 = vmatpush.bf16.msrb.mxu3 %v3275_v61 }
 0x102   :  { %1953 = vmatpush.bf16.msrb.mxu0 %v2875_v2  ;;  %1966 = vmatpush.bf16.msrb.mxu1 %v3003_v4  ;;  %v1760_v21 = vpop.f32.mrf.mxu1 }
 0x103   :  { %1979 = vmatpush.bf16.msrb.mxu2 %v3131_v5 }
 0x104   :  { %1992 = vmatpush.bf16.msrb.mxu3 %v3259_v10 }
 0x105   :  { %1954 = vmatmul.bf16.vlgmr.msrb.gmra.mxu0 %v4293_v37  ;;  %1967 = vmatmul.bf16.vlgmr.msrb.gmra.mxu1 %v4297_v40  ;;  %v1735_v37 = vadd.f32 %v5390_v32, %v1722_v17  ;;  %v1747_v40 = vpop.f32.mrf.mxu0  ;;  %v3776_v32 = vld [vmem:[%s5566_s3 + $0xa0] sm:$0xff] }
 0x106   :  { %2266 = vmatpush.bf16.msra.mxu0 %v3763_v11  ;;  %2279 = vmatpush.bf16.msra.mxu1 %v3771_v12  ;;  %v3787_v11 = vld [vmem:[%s5566_s3 + $0xf8] sm:$0xff] }
 0x107   :  { %1980 = vmatmul.bf16.vlgmr.msrb.gmra.mxu2 %v4285_v34  ;;  %1993 = vmatmul.bf16.vlgmr.msrb.gmra.mxu3 %v4295_v38  ;;  %v3760_v34 = vld [vmem:[%s5566_s3 + $0x20] sm:$0xff]  ;;  %v1748_v20 = vadd.f32 %v1747_v40, %v1735_v37  ;;  %v3783_v40 = vld [vmem:[%s5566_s3 + $0xd8] sm:$0xff] }
 0x108   :  { %2292 = vmatpush.bf16.msra.mxu2 %v3779_v16  ;;  %v3768_v38 = vld [vmem:[%s5566_s3 + $0x60] sm:$0xff]  ;;  %2305 = vmatpush.bf16.msra.mxu3 %v3787_v11 }
 0x109   :  { %v1761_v24 = vadd.f32 %v1760_v21, %v1748_v20 }
 0x10a   :  { %2267 = vmatpush.bf16.msra.mxu0 %v3762_v3  ;;  %2280 = vmatpush.bf16.msra.mxu1 %v3770_v13  ;;  %v1786_v27 = vpop.f32.mrf.mxu3  ;;  %v1762_v35 = vpop.f32.mrf.mxu1  ;;  %v3786_v3 = vld [vmem:[%s5566_s3 + $0xf0] sm:$0xff] }
 0x10b   :  { %v1773_v7 = vpop.f32.mrf.mxu2 }
 0x10c   :  { %2293 = vmatpush.bf16.msra.mxu2 %v3778_v22  ;;  %v1774_v30 = vadd.f32 %v1773_v7, %v1761_v24  ;;  %2306 = vmatpush.bf16.msra.mxu3 %v3786_v3  ;;  %v3781_v22 = vld [vmem:[%s5566_s3 + $0xc8] sm:$0xff]  ;;  %v3780_v7 = vld [vmem:[%s5566_s3 + $0xc0] sm:$0xff] }
 0x10d   :  { %v1749_v31 = vpop.f32.mrf.mxu0 }
 0x10e   :  { %2268 = vmatpush.bf16.msra.mxu0 %v3761_v18  ;;  %2281 = vmatpush.bf16.msra.mxu1 %v3769_v19  ;;  %v1787_v36 = vadd.f32 %v1786_v27, %v1774_v30  ;;  %v3785_v18 = vld [vmem:[%s5566_s3 + $0xe8] sm:$0xff] }
 0x110   :  { %2294 = vmatpush.bf16.msra.mxu2 %v3777_v28  ;;  %v1999_v45 = vmax.f32 %v1787_v36, 0.0  ;;  %2307 = vmatpush.bf16.msra.mxu3 %v3785_v18  ;;  %v297_v28 = vperm.slane %v4936_v6, 3 }
 0x112   :  { %2269 = vmatpush.bf16.msra.mxu0 %v3760_v34  ;;  %2282 = vmatpush.bf16.msra.mxu1 %v3768_v38  ;;  %v1788_v44 = vpop.f32.mrf.mxu3  ;;  %v2003_v50 = vpack.c.bf16 %v1999_v45, %v1999_v45  ;;  %v3784_v34 = vld [vmem:[%s5566_s3 + $0xe0] sm:$0xff]  ;;  %v3782_v38 = vld [vmem:[%s5566_s3 + $0xd0] sm:$0xff] }
 0x113   :  { %v1775_v43 = vpop.f32.mrf.mxu2 }
 0x114   :  { %2295 = vmatpush.bf16.msra.mxu2 %v3776_v32  ;;  %2308 = vmatpush.bf16.msra.mxu3 %v3784_v34 }
 0x116   :  { %2270 = vmatpush.bf16.msra.mxu0 %v3759_v23  ;;  %2283 = vmatpush.bf16.msra.mxu1 %v3767_v26 }
 0x118   :  { %2296 = vmatpush.bf16.msra.mxu2 %v3775_v41  ;;  %2309 = vmatpush.bf16.msra.mxu3 %v3783_v40 }
 0x11a   :  { %2271 = vmatpush.bf16.msra.mxu0 %v3758_v29  ;;  %2284 = vmatpush.bf16.msra.mxu1 %v3766_v33 }
 0x11c   :  { %2297 = vmatpush.bf16.msra.mxu2 %v3774_v54  ;;  %2310 = vmatpush.bf16.msra.mxu3 %v3782_v38 }
 0x11e   :  { %2272 = vmatpush.bf16.msra.mxu0 %v3757_v39  ;;  %2285 = vmatpush.bf16.msra.mxu1 %v3765_v42 }
 0x120   :  { %2298 = vmatpush.bf16.msra.mxu2 %v3773_v56  ;;  %2311 = vmatpush.bf16.msra.mxu3 %v3781_v22 }
 0x122   :  { %2273 = vmatpush.bf16.msra.mxu0 %v3756_v46  ;;  %2286 = vmatpush.bf16.msra.mxu1 %v3764_v49  ;;  %v1799_v52 = vpop.f32.mrf.mxu0  ;;  %v1812_v53 = vpop.f32.mrf.mxu1 }
 0x123   :  { %v1800_v9 = vadd.f32 %v1799_v52, %v296_v59 }
 0x124   :  { %2299 = vmatpush.bf16.msra.mxu2 %v3772_v58  ;;  %2312 = vmatpush.bf16.msra.mxu3 %v3780_v7 }
 0x125   :  { %2274 = vmatmul.bf16.vlgmr.msra.gmra.mxu0 %v2002_v51  ;;  %2287 = vmatmul.bf16.vlgmr.msra.gmra.mxu1 %v2003_v50  ;;  %v1813_v15 = vadd.f32 %v1812_v53, %v1800_v9  ;;  %v3788_v53 = vld [vmem:[%s5567_s4] ss:$0 sm:$0xff] }
 0x12a   :  { %v1838_v48 = vpop.f32.mrf.mxu3  ;;  %v1801_v8 = vpop.f32.mrf.mxu0 }
 0x12b   :  { %v1825_v55 = vpop.f32.mrf.mxu2  ;;  %v1814_v57 = vpop.f32.mrf.mxu1 }
 0x12c   :  { %v1826_v25 = vadd.f32 %v1825_v55, %v1813_v15 }
 0x12e   :  { %v1839_v62 = vadd.f32 %v1838_v48, %v1826_v25 }
 0x132   :  { %v1840_v61 = vpop.f32.mrf.mxu3 }
 0x133   :  { %v1827_v60 = vpop.f32.mrf.mxu2 }
 0x142   :  { %v1851_v63 = vpop.f32.mrf.mxu0  ;;  %v1864_v1 = vpop.f32.mrf.mxu1 }
 0x143   :  { %v1852_v0 = vadd.f32 %v1851_v63, %v1839_v62 }
 0x145   :  { %v1865_v2 = vadd.f32 %v1864_v1, %v1852_v0 }
 0x14a   :  { %v1890_v10 = vpop.f32.mrf.mxu3  ;;  %v1853_v14 = vpop.f32.mrf.mxu0 }
 0x14b   :  { %v1877_v4 = vpop.f32.mrf.mxu2  ;;  %v1866_v16 = vpop.f32.mrf.mxu1 }
 0x14c   :  { %v1878_v5 = vadd.f32 %v1877_v4, %v1865_v2 }
 0x14e   :  { %v1891_v12 = vadd.f32 %v1890_v10, %v1878_v5 }
 0x150   :  { %v2000_v13 = vmax.f32 %v1891_v12, 0.0 }
 0x152   :  { %v2004_v17 = vpack.c.bf16 %v2000_v13, %v2000_v13  ;;  %v1892_v19 = vpop.f32.mrf.mxu3 }
 0x153   :  { %v1879_v37 = vpop.f32.mrf.mxu2 }
 0x154   :  { %2300 = vmatmul.bf16.vlgmr.msra.gmra.mxu2 %v2004_v17 }
 0x162   :  { %v1903_v20 = vpop.f32.mrf.mxu0  ;;  %v1916_v21 = vpop.f32.mrf.mxu1 }
 0x163   :  { %v1904_v31 = vadd.f32 %v1903_v20, %v297_v28 }
 0x165   :  { %v1917_v32 = vadd.f32 %v1916_v21, %v1904_v31 }
 0x16a   :  { %v1942_v24 = vpop.f32.mrf.mxu3  ;;  %v1905_v26 = vpop.f32.mrf.mxu0 }
 0x16b   :  { %v1929_v23 = vpop.f32.mrf.mxu2  ;;  %v1918_v27 = vpop.f32.mrf.mxu1 }
 0x16c   :  { %v1930_v33 = vadd.f32 %v1929_v23, %v1917_v32 }
 0x16e   :  { %v1943_v35 = vadd.f32 %v1942_v24, %v1930_v33 }
 0x172   :  { %v1944_v30 = vpop.f32.mrf.mxu3 }
 0x173   :  { %v1931_v29 = vpop.f32.mrf.mxu2 }
 0x182   :  { %v1955_v36 = vpop.f32.mrf.mxu0  ;;  %v1968_v39 = vpop.f32.mrf.mxu1 }
 0x183   :  { %v1956_v41 = vadd.f32 %v1955_v36, %v1943_v35 }
 0x185   :  { %v1969_v42 = vadd.f32 %v1968_v39, %v1956_v41 }
 0x18a   :  { %v1981_v43 = vpop.f32.mrf.mxu2  ;;  %v1994_v45 = vpop.f32.mrf.mxu3 }
 0x18b   :  { %v1982_v44 = vadd.f32 %v1981_v43, %v1969_v42  ;;  %v1957_v46 = vpop.f32.mrf.mxu0  ;;  %v1970_v47 = vpop.f32.mrf.mxu1 }
 0x18d   :  { %v1995_v49 = vadd.f32 %v1994_v45, %v1982_v44 }
 0x18f   :  { %v2001_v50 = vmax.f32 %v1995_v49, 0.0 }
 0x191   :  { %v2005_v51 = vpack.c.bf16 %v2001_v50, %v2001_v50 }
 0x192   :  { %v1983_v52 = vpop.f32.mrf.mxu2  ;;  %v1996_v6 = vpop.f32.mrf.mxu3 }
 0x193   :  { %2313 = vmatmul.bf16.vlgmr.msra.gmra.mxu3 %v2005_v51 }
 0x1a2   :  { %v2275_v54 = vpop.f32.mrf.mxu0  ;;  %v2288_v48 = vpop.f32.mrf.mxu1 }
 0x1a3   :  { %v2276_v55 = vadd.f32 %v3788_v53, %v2275_v54 }
 0x1a5   :  { %v2289_v56 = vadd.f32 %v2288_v48, %v2276_v55 }
 0x1aa   :  { %v2277_v8 = vpop.f32.mrf.mxu0  ;;  %v2290_v57 = vpop.f32.mrf.mxu1 }
 0x1d7   :  { %v2301_v58 = vpop.f32.mrf.mxu2 }
 0x1d8   :  { %v2302_v60 = vadd.f32 %v2301_v58, %v2289_v56 }
 0x1df   :  { %v2303_v59 = vpop.f32.mrf.mxu2 }
 0x216   :  { %v2314_v61 = vpop.f32.mrf.mxu3 }
 0x217   :  { %v2315_v9 = vadd.f32 %v2314_v61, %v2302_v60 }
 0x219   :  { %v2319_v15 = vsel %vm2318_vm0, %v2315_v9, -inf }
 0x21a   :  { %2320 = vmax.xlane.f32.xlu0 %v2319_v15 }
 0x21e   :  { %v2316_v25 = vpop.f32.mrf.mxu3 }
 0x28d   :  { %v2321_v62 = vpop.xlane.xlu0 %2320 }
 0x28e   :  { %v2322_v63 = vsub.f32 %v2315_v9, %v2321_v62 }
 0x290   :  { %v2323_v0 = vmul.f32 1.442695, %v2322_v63 }
 0x292   :  { %3789 = vpow2.f32 %v2323_v0 }
 0x298   :  { %v3790_v1 = vpop.eup %3789 }
 0x299   :  { %v2325_v2 = vsel %vm2318_vm0, %v3790_v1, 0.0 }
 0x29a   :  { %2326 = vadd.xlane.f32.xlu0 %v2325_v2 }
 0x30d   :  { %v2327_v4 = vpop.xlane.xlu0 %2326 }
 0x30e   :  { %3791 = vrcp.f32 %v2327_v4  ;;  %v2339_v12 = vand.u32 2147483648, %v2327_v4  ;;  %v2337_v3 = vand.u32 2147483647, %v2327_v4  ;;  %vm2333_vm2 = vweird.f32 %v2327_v4 }
 0x310   :  { %v2340_v13 = vor.u32 1.1754944e-38, %v2339_v12  ;;  %vm2338_vm4 = vcmp.eq.f32.partialorder %v2337_v3, 8.507059e+37 }
 0x314   :  { %v3792_v5 = vpop.eup %3791 }
 0x315   :  { %v2329_v10 = vmul.f32 %v3792_v5, %v2327_v4  ;;  %vm2334_vm1 = vweird.f32 %v3792_v5 }
 0x316   :  { %vm2335_vm3 = vmor %vm2333_vm2, %vm2334_vm1 }
 0x317   :  { %v2330_v11 = vsub.f32 1.0, %v2329_v10 }
 0x319   :  { %v2331_v14 = vmul.f32 %v3792_v5, %v2330_v11 }
 0x31b   :  { %v2332_v16 = vadd.f32 %v3792_v5, %v2331_v14 }
 0x31d   :  { %v2336_v17 = vsel %vm2335_vm3, %v3792_v5, %v2332_v16 }
 0x31e   :  { %v2341_v18 = vsel %vm2338_vm4, %v2340_v13, %v2336_v17 }
 0x31f   :  { %v2342_v37 = vmul.f32 %v3790_v1, %v2341_v18 }
 0x321   :  { %2343 = vst.msk [vmem:[%s5568_s5] sm:$0xff] %vm2318_vm0, %v2342_v37 }

</bundles_post_ra>
